<compile_context>
chip_gen: v6e
topology: v6e:2x2x1
jax: 0.10.0
libtpu: 0.0.40
codegen_flags: <defaults>
</compile_context>

<pallas_src>
import jax
import jax.numpy as jnp
from jax.experimental import pallas as pl
from jax.experimental.pallas import tpu as pltpu

EPS = 1e-5


# ------------------------------ in-kernel helpers ----------------------------
def _flatten_batch(ref, nb):
    """(nb, C, L) block -> (C, nb*L): samples laid side by side on lanes."""
    if nb == 1:
        return ref[0]
    return jnp.concatenate([ref[n] for n in range(nb)], axis=1)


def _shift_stack(a, L):
    """a: (C, TL), TL = nb*L -> (3C, TL): rows [a[l-1]; a[l]; a[l+1]] per
    sample, with zero columns at each sample's k=3 / padding=1 boundary."""
    C, TL = a.shape
    z = jnp.zeros((C, 1), a.dtype)
    prev = jnp.concatenate([z, a[:, :TL - 1]], axis=1)        # in[l-1]
    nxt = jnp.concatenate([a[:, 1:], z], axis=1)              # in[l+1]
    if TL != L:
        # zero the columns where the shift crossed a sample boundary
        pos = jax.lax.broadcasted_iota(jnp.int32, (1, TL), 1) % L
        prev = jnp.where(pos != 0, prev, 0.0)
        nxt = jnp.where(pos != (L - 1), nxt, 0.0)
    # TODO(synk): build prev/nxt with pltpu.roll(+mask) so the shifts run on
    # the (idle) XLU slot instead of vector load/store copies.
    return jnp.concatenate([prev, a, nxt], axis=0)


# ----------------------------------- Pass A ----------------------------------
# r = conv2(conv1(x)) with conv1 folded into conv2, plus per-tile per-channel
# (sum, sum-of-squares) partials for the global BatchNorm batch statistics.
def _pass_a_kernel(x_ref, w12_ref, b2_ref, r_ref, stats_ref):
    nb, _, L = x_ref.shape
    TL = nb * L
    x = _flatten_batch(x_ref, nb)                                   # (Cin, TL) bf16
    ones = jnp.ones((1, TL), x.dtype)                               # conv1-bias channel
    sx = _shift_stack(jnp.concatenate([x, ones], axis=0), L)        # (3*(Cin+1), TL)
    r = jnp.dot(w12_ref[...], sx,
                preferred_element_type=jnp.float32) + b2_ref[...]   # (Cout, TL) f32
    r_ref[...] = r.astype(r_ref.dtype)                              # one lane-dense store
    cout = r.shape[0]
    s1 = jnp.sum(r, axis=1).reshape(1, cout)
    s2 = jnp.sum(r * r, axis=1).reshape(1, cout)
    stats_ref[0] = jnp.concatenate([s1, s2], axis=0)                # (2, Cout) lane-dense


# ----------------------------------- Pass B ----------------------------------
# out = relu(conv1(x) + conv3(relu(BN(r)))), BN pre-folded into scale/shift.
def _pass_b_kernel(x_ref, r_ref, w1_ref, b1_ref, scale_ref, shift_ref,
                   w3_ref, b3_ref, o_ref):
    nb, _, L = x_ref.shape
    x = _flatten_batch(x_ref, nb)                                   # (Cin, TL) bf16
    # residual branch: conv1 (k=1) as one pointwise matmul (Cin is tiny, so
    # recomputing it here is cheaper than an HBM round trip of y).
    y = jnp.dot(w1_ref[...], x,
                preferred_element_type=jnp.float32) + b1_ref[...]   # (Cout, TL)
    rn = jnp.maximum(r_ref[...].astype(jnp.float32) * scale_ref[...]
                     + shift_ref[...], 0.0)                         # BN + ReLU
    s = _shift_stack(rn.astype(jnp.bfloat16), L)                    # (3*Cout, TL)
    r3 = jnp.dot(w3_ref[...], s,
                 preferred_element_type=jnp.float32) + b3_ref[...]  # conv3
    out = jnp.maximum(y + r3, 0.0).astype(o_ref.dtype)              # (Cout, TL)
    for n in range(nb):                                             # (Cout, L) lane-dense
        o_ref[n] = out[:, n * L:(n + 1) * L]


# --------------------------------- wrapper -----------------------------------
def _full_spec(shape):
    nd = len(shape)
    return pl.BlockSpec(shape, lambda *_: (0,) * nd)


def _choose_nb(N, L, Cin, Cout):
    """Samples per grid step: a divisor of N (no padding -> exact BN stats),
    big enough to stream >=512 lanes / >=128 KiB tiles, small enough to keep
    the per-step VMEM footprint modest."""
    def step_bytes(nb):
        TL = nb * L
        blocks = 2 * (nb * Cin * L * 2 + Cout * TL * 2 + nb * Cout * L * 4)
        interm = 3 * (Cin + 1) * TL * 2 + 3 * Cout * TL * 2 + 4 * Cout * TL * 4
        return blocks + interm

    budget = 24 * 2 ** 20
    divisors = [d for d in range(1, N + 1) if N % d == 0]
    fitting = [d for d in divisors if step_bytes(d) <= budget] or [1]
    lane_ok = [d for d in fitting
               if d * L >= 512 and d * Cout * L * 4 >= (128 << 10)]
    return min(lane_ok) if lane_ok else max(fitting)


def _vmem_limit_bytes(nb, Cin, Cout, L):
    """Double-buffered I/O blocks + weights + live intermediates + headroom,
    capped below the physical VMEM of the current generation."""
    TL = nb * L
    blocks = 2 * (nb * Cin * L * 2          # x block (bf16)
                  + Cout * TL * 2           # r block (bf16)
                  + nb * Cout * L * 4       # out block (f32)
                  + 2 * Cout * 4)           # stats block (f32)
    weights = 2 * (Cout * 3 * (Cin + 1) * 2 + Cout * 3 * Cout * 2
                   + Cout * Cin * 2 + 4 * Cout * 4)
    live = (3 * (Cin + 1) * TL * 2 + 3 * Cout * TL * 2   # bf16 shift stacks
            + 4 * Cout * TL * 4)                          # f32 y / r / rn / out
    est = int(1.25 * (blocks + weights + live))
    try:
        phys = getattr(pltpu.get_tpu_info(), "vmem_capacity_bytes", None)
    except Exception:
        phys = None
    phys = phys or (64 * 2 ** 20)           # v7x has the smallest VMEM (64 MiB)
    return max(16 * 2 ** 20, min(est, int(phys * 0.75)))


@jax.jit
def rrb_forward(x_ncl, params):
    """x_ncl: (N, Cin, L) -> (N, Cout, L) float32 (PyTorch NCL layout)."""
    N, Cin, L = x_ncl.shape
    Cout = params["w1"].shape[0]
    nb = _choose_nb(N, L, Cin, Cout)
    n_tiles = N // nb
    TL = nb * L

    # ---- parameter prep: fold conv1 into conv2 (f32), bf16 MXU operands ----
    w1 = params["w1"][:, :, 0].astype(jnp.float32)                  # (Cout, Cin)
    b1 = params["b1"].reshape(Cout, 1).astype(jnp.float32)
    w1_aug = jnp.concatenate([w1, b1], axis=1)                      # (Cout, Cin+1)
    w12 = jnp.concatenate(
        [params["w2"][:, :, k].astype(jnp.float32) @ w1_aug for k in range(3)],
        axis=1).astype(jnp.bfloat16)                                # (Cout, 3*(Cin+1))
    b2 = params["b2"].reshape(Cout, 1).astype(jnp.float32)
    w3 = jnp.concatenate([params["w3"][:, :, k] for k in range(3)],
                         axis=1).astype(jnp.bfloat16)               # (Cout, 3*Cout)
    b3 = params["b3"].reshape(Cout, 1).astype(jnp.float32)
    w1b = w1.astype(jnp.bfloat16)

    # x is read by both passes: cast to bf16 once in the wrapper.
    xb = x_ncl if x_ncl.dtype == jnp.bfloat16 else x_ncl.astype(jnp.bfloat16)

    cparams = pltpu.CompilerParams(
        dimension_semantics=("parallel",),           # megacore split on v7x
        vmem_limit_bytes=_vmem_limit_bytes(nb, Cin, Cout, L))

    x_spec = pl.BlockSpec((nb, Cin, L), lambda i: (i, 0, 0))
    out_spec = pl.BlockSpec((nb, Cout, L), lambda i: (i, 0, 0))
    # the pre-BN activation r is internal: keep it lane-flat (Cout, N*L) so
    # both passes touch it with a single lane-dense block per step.
    r_spec = pl.BlockSpec((Cout, TL), lambda i: (0, i))
    stats_spec = pl.BlockSpec((1, 2, Cout), lambda i: (i, 0, 0))

    # ---- Pass A: r = conv2(conv1(x)) (folded) + BN-stat partials -----------
    r_pre, stat_parts = pl.pallas_call(
        _pass_a_kernel,
        grid=(n_tiles,),
        in_specs=[x_spec, _full_spec(w12.shape), _full_spec(b2.shape)],
        out_specs=[r_spec, stats_spec],
        out_shape=[jax.ShapeDtypeStruct((Cout, N * L), jnp.bfloat16),
                   jax.ShapeDtypeStruct((n_tiles, 2, Cout), jnp.float32)],
        compiler_params=cparams,
    )(xb, w12, b2)

    # ---- finalize BatchNorm batch stats -> folded scale / shift (f32) ------
    # TODO(synk): nn.BatchNorm1d's running-stats (momentum) update is module
    # state, not part of the forward output, and is not produced here.
    stats = jnp.sum(stat_parts, axis=0)                              # (2, Cout)
    cnt = float(N * L)
    mean = stats[0] / cnt
    # NOTE: E[x^2]-E[x]^2 in f32 is cancellation-prone for large DC offsets;
    # the reference uses the same biased variance, so match it and clamp at 0.
    var = jnp.maximum(stats[1] / cnt - mean * mean, 0.0)
    scale = params["gamma"].astype(jnp.float32) * jax.lax.rsqrt(var + EPS)
    shift = params["beta"].astype(jnp.float32) - mean * scale
    scale = scale.reshape(Cout, 1)
    shift = shift.reshape(Cout, 1)

    # ---- Pass B: BN+ReLU -> conv3 -> residual(conv1) -> ReLU ---------------
    out = pl.pallas_call(
        _pass_b_kernel,
        grid=(n_tiles,),
        in_specs=[x_spec, r_spec, _full_spec(w1b.shape), _full_spec(b1.shape),
                  _full_spec(scale.shape), _full_spec(shift.shape),
                  _full_spec(w3.shape), _full_spec(b3.shape)],
        out_specs=out_spec,
        out_shape=jax.ShapeDtypeStruct((N, Cout, L), jnp.float32),
        compiler_params=cparams,
    )(xb, r_pre, w1b, b1, scale, shift, w3, b3)
    return out


# ---------------- pure-JAX reference (PyTorch semantics, f32) ----------------
def _conv1d_ref(x, w, b, pad):
    out = jax.lax.conv_general_dilated(
        x, w, window_strides=(1,), padding=[(pad, pad)],
        dimension_numbers=("NCH", "OIH", "NCH"))
    return out + b[None, :, None]


def rrb_ref(x, p):
    y = _conv1d_ref(x, p["w1"], p["b1"], 0)
    r = _conv1d_ref(y, p["w2"], p["b2"], 1)
    mean = r.mean(axis=(0, 2), keepdims=True)
    var = ((r - mean) ** 2).mean(axis=(0, 2), keepdims=True)
    r = (r - mean) * jax.lax.rsqrt(var + EPS)
    r = r * p["gamma"][None, :, None] + p["beta"][None, :, None]
    r = jnp.maximum(r, 0.0)
    r = _conv1d_ref(r, p["w3"], p["b3"], 1)
    return jnp.maximum(y + r, 0.0)


if __name__ == "__main__":
    # small but lane-friendly shapes: L a multiple of 128 -> lane-dense stores
    N, Cin, L, Cout = 2, 4, 128, 64
    key = jax.random.PRNGKey(0)
    ks = jax.random.split(key, 9)

    x = jax.random.normal(ks[0], (N, Cin, L), jnp.float32)
    params = dict(
        w1=0.1 * jax.random.normal(ks[1], (Cout, Cin, 1), jnp.float32),
        b1=0.1 * jax.random.normal(ks[2], (Cout,), jnp.float32),
        w2=0.1 * jax.random.normal(ks[3], (Cout, Cout, 3), jnp.float32),
        b2=0.1 * jax.random.normal(ks[4], (Cout,), jnp.float32),
        gamma=1.0 + 0.1 * jax.random.normal(ks[5], (Cout,), jnp.float32),
        beta=0.1 * jax.random.normal(ks[6], (Cout,), jnp.float32),
        w3=0.1 * jax.random.normal(ks[7], (Cout, Cout, 3), jnp.float32),
        b3=0.1 * jax.random.normal(ks[8], (Cout,), jnp.float32),
    )

    out = jax.block_until_ready(rrb_forward(x, params))
    ref = rrb_ref(x, params)
    assert out.shape == (N, Cout, L), out.shape

    err = float(jnp.max(jnp.abs(out - ref)))
    # bf16 MXU operands (f32 accumulation) -> small drift vs the f32 reference
    tol = 5e-2 * (1.0 + float(jnp.max(jnp.abs(ref))))
    if err < tol:
        print("KERNEL_OK")
    else:
        raise SystemExit(f"mismatch: max abs err {err:.4e} (tol {tol:.4e})")
</pallas_src>

<mosaic_0001>
module attributes {stable_mosaic.version = 11 : i64} {
  func.func @_pass_a_kernel(%arg0: i32, %arg1: memref<2x4x128xbf16, #tpu.memory_space<vmem>>, %arg2: memref<64x15xbf16, #tpu.memory_space<vmem>>, %arg3: memref<64x1xf32, #tpu.memory_space<vmem>>, %arg4: memref<64x256xbf16, #tpu.memory_space<vmem>>, %arg5: memref<1x2x64xf32, #tpu.memory_space<vmem>>) attributes {dimension_semantics = [#tpu.dimension_semantics<parallel>], iteration_bounds = array<i64: 1>, scalar_prefetch = 0 : i64, scratch_operands = 0 : i64, tpu.core_type = #tpu.core_type<tc>, window_params = [{transform_indices = @transform_0, window_bounds = array<i64: 2, 4, 128>}, {pipeline_mode = #tpu.pipeline_mode<synchronous>, transform_indices = @transform_1, window_bounds = array<i64: 64, 15>}, {pipeline_mode = #tpu.pipeline_mode<synchronous>, transform_indices = @transform_2, window_bounds = array<i64: 64, 1>}, {transform_indices = @transform_3, window_bounds = array<i64: 64, 256>}, {transform_indices = @transform_4, window_bounds = array<i64: 1, 2, 64>}]} {
    %c0 = arith.constant 0 : index
    %c0_0 = arith.constant 0 : index
    %c0_1 = arith.constant 0 : index
    %0 = vector.load %arg1[%c0, %c0_0, %c0_1] : memref<2x4x128xbf16, #tpu.memory_space<vmem>>, vector<1x4x128xbf16>
    %1 = vector.shape_cast %0 : vector<1x4x128xbf16> to vector<4x128xbf16>
    %c1 = arith.constant 1 : index
    %c0_2 = arith.constant 0 : index
    %c0_3 = arith.constant 0 : index
    %2 = vector.load %arg1[%c1, %c0_2, %c0_3] : memref<2x4x128xbf16, #tpu.memory_space<vmem>>, vector<1x4x128xbf16>
    %3 = vector.shape_cast %2 : vector<1x4x128xbf16> to vector<4x128xbf16>
    %4 = tpu.concatenate %1, %3 in 1 : vector<4x128xbf16>, vector<4x128xbf16> -> vector<4x256xbf16>
    %cst = arith.constant 1.000000e+00 : bf16
    %5 = vector.broadcast %cst : bf16 to vector<1x256xbf16>
    %6 = tpu.concatenate %4, %5 in 0 : vector<4x256xbf16>, vector<1x256xbf16> -> vector<5x256xbf16>
    %cst_4 = arith.constant 0.000000e+00 : bf16
    %7 = vector.broadcast %cst_4 : bf16 to vector<5x1xbf16>
    %8 = vector.extract_strided_slice %6 {offsets = [0, 0], sizes = [5, 255], strides = [1, 1]} : vector<5x256xbf16> to vector<5x255xbf16>
    %9 = tpu.concatenate %7, %8 in 1 : vector<5x1xbf16>, vector<5x255xbf16> -> vector<5x256xbf16>
    %10 = vector.extract_strided_slice %6 {offsets = [0, 1], sizes = [5, 255], strides = [1, 1]} : vector<5x256xbf16> to vector<5x255xbf16>
    %11 = tpu.concatenate %10, %7 in 1 : vector<5x255xbf16>, vector<5x1xbf16> -> vector<5x256xbf16>
    %12 = tpu.iota {dimensions = array<i32: 1>} : vector<1x256xi32>
    %c128_i32 = arith.constant 128 : i32
    %c0_i32 = arith.constant 0 : i32
    %13 = arith.cmpi eq, %c128_i32, %c0_i32 : i32
    %c1_i32 = arith.constant 1 : i32
    %14 = arith.select %13, %c1_i32, %c128_i32 : i32
    %15 = vector.broadcast %14 : i32 to vector<1x256xi32>
    %16 = arith.remsi %12, %15 : vector<1x256xi32>
    %c0_i32_5 = arith.constant 0 : i32
    %17 = vector.broadcast %c0_i32_5 : i32 to vector<1x256xi32>
    %18 = arith.cmpi ne, %16, %17 : vector<1x256xi32>
    %c0_i32_6 = arith.constant 0 : i32
    %19 = vector.broadcast %c0_i32_6 : i32 to vector<1x256xi32>
    %20 = arith.cmpi slt, %16, %19 : vector<1x256xi32>
    %c0_i32_7 = arith.constant 0 : i32
    %21 = arith.cmpi slt, %14, %c0_i32_7 : i32
    %22 = vector.broadcast %21 : i1 to vector<1x256xi1>
    %23 = vector.broadcast %22 : vector<1x256xi1> to vector<1x256xi1>
    %24 = arith.xori %20, %23 : vector<1x256xi1>
    %25 = arith.andi %24, %18 : vector<1x256xi1>
    %26 = vector.broadcast %14 : i32 to vector<1x256xi32>
    %27 = arith.addi %16, %26 : vector<1x256xi32>
    %28 = arith.select %25, %27, %16 : vector<1x256xi1>, vector<1x256xi32>
    %c0_i32_8 = arith.constant 0 : i32
    %29 = vector.broadcast %c0_i32_8 : i32 to vector<1x256xi32>
    %30 = arith.cmpi ne, %28, %29 : vector<1x256xi32>
    %cst_9 = arith.constant 0.000000e+00 : f32
    %31 = arith.truncf %cst_9 : f32 to bf16
    %32 = vector.shape_cast %30 : vector<1x256xi1> to vector<1x256xi1>
    %33 = vector.broadcast %32 : vector<1x256xi1> to vector<5x256xi1>
    %34 = vector.broadcast %31 : bf16 to vector<5x256xbf16>
    %35 = arith.select %33, %9, %34 : vector<5x256xi1>, vector<5x256xbf16>
    %c127_i32 = arith.constant 127 : i32
    %36 = vector.broadcast %c127_i32 : i32 to vector<1x256xi32>
    %37 = arith.cmpi ne, %28, %36 : vector<1x256xi32>
    %cst_10 = arith.constant 0.000000e+00 : f32
    %38 = arith.truncf %cst_10 : f32 to bf16
    %39 = vector.shape_cast %37 : vector<1x256xi1> to vector<1x256xi1>
    %40 = vector.broadcast %39 : vector<1x256xi1> to vector<5x256xi1>
    %41 = vector.broadcast %38 : bf16 to vector<5x256xbf16>
    %42 = arith.select %40, %11, %41 : vector<5x256xi1>, vector<5x256xbf16>
    %43 = tpu.concatenate %35, %6, %42 in 0 : vector<5x256xbf16>, vector<5x256xbf16>, vector<5x256xbf16> -> vector<15x256xbf16>
    %c0_11 = arith.constant 0 : index
    %c0_12 = arith.constant 0 : index
    %44 = vector.load %arg2[%c0_11, %c0_12] : memref<64x15xbf16, #tpu.memory_space<vmem>>, vector<64x15xbf16>
    %cst_13 = arith.constant dense<0.000000e+00> : vector<64x256xf32>
    %45 = tpu.matmul %44, %43, %cst_13 {dimension_numbers = #tpu.dot_dimension_numbers<[1], [0], [0], [1], [0, 0, 1, 1], [], []>} : vector<64x15xbf16>, vector<15x256xbf16>, vector<64x256xf32> -> vector<64x256xf32>
    %c0_14 = arith.constant 0 : index
    %c0_15 = arith.constant 0 : index
    %46 = vector.load %arg3[%c0_14, %c0_15] : memref<64x1xf32, #tpu.memory_space<vmem>>, vector<64x1xf32>
    %47 = vector.broadcast %46 : vector<64x1xf32> to vector<64x256xf32>
    %48 = arith.addf %45, %47 : vector<64x256xf32>
    %49 = arith.truncf %48 : vector<64x256xf32> to vector<64x256xbf16>
    %c0_16 = arith.constant 0 : index
    %c0_17 = arith.constant 0 : index
    %50 = vector.load %arg4[%c0_16, %c0_17] : memref<64x256xbf16, #tpu.memory_space<vmem>>, vector<64x256xbf16>
    tpu.vector_store %arg4[%c0_16, %c0_17], %49 {strides = array<i32>} : memref<64x256xbf16, #tpu.memory_space<vmem>>, vector<64x256xbf16>,
    %cst_18 = arith.constant dense<0.000000e+00> : vector<64xf32>
    %51 = vector.multi_reduction <add>, %48, %cst_18 [1] : vector<64x256xf32> to vector<64xf32>
    %52 = vector.shape_cast %51 : vector<64xf32> to vector<1x64xf32>
    %53 = arith.mulf %48, %48 : vector<64x256xf32>
    %cst_19 = arith.constant dense<0.000000e+00> : vector<64xf32>
    %54 = vector.multi_reduction <add>, %53, %cst_19 [1] : vector<64x256xf32> to vector<64xf32>
    %55 = vector.shape_cast %54 : vector<64xf32> to vector<1x64xf32>
    %56 = tpu.concatenate %52, %55 in 0 : vector<1x64xf32>, vector<1x64xf32> -> vector<2x64xf32>
    %c0_20 = arith.constant 0 : index
    %c0_21 = arith.constant 0 : index
    %c0_22 = arith.constant 0 : index
    %57 = vector.load %arg5[%c0_20, %c0_21, %c0_22] : memref<1x2x64xf32, #tpu.memory_space<vmem>>, vector<1x2x64xf32>
    %58 = vector.shape_cast %57 : vector<1x2x64xf32> to vector<2x64xf32>
    %59 = vector.shape_cast %56 : vector<2x64xf32> to vector<1x2x64xf32>
    tpu.vector_store %arg5[%c0_20, %c0_21, %c0_22], %59 {strides = array<i32>} : memref<1x2x64xf32, #tpu.memory_space<vmem>>, vector<1x2x64xf32>,
    return
  }
  func.func @transform_0(%arg0: i32) -> (i32, i32, i32) {
    %c0_i32 = arith.constant 0 : i32
    %c0_i32_0 = arith.constant 0 : i32
    %c0_i32_1 = arith.constant 0 : i32
    return %arg0, %c0_i32, %c0_i32_0 : i32, i32, i32
  }
  func.func @transform_1(%arg0: i32) -> (i32, i32) {
    %c0_i32 = arith.constant 0 : i32
    %c0_i32_0 = arith.constant 0 : i32
    %c0_i32_1 = arith.constant 0 : i32
    return %c0_i32, %c0_i32_0 : i32, i32
  }
  func.func @transform_2(%arg0: i32) -> (i32, i32) {
    %c0_i32 = arith.constant 0 : i32
    %c0_i32_0 = arith.constant 0 : i32
    %c0_i32_1 = arith.constant 0 : i32
    return %c0_i32, %c0_i32_0 : i32, i32
  }
  func.func @transform_3(%arg0: i32) -> (i32, i32) {
    %c0_i32 = arith.constant 0 : i32
    %c0_i32_0 = arith.constant 0 : i32
    return %c0_i32, %arg0 : i32, i32
  }
  func.func @transform_4(%arg0: i32) -> (i32, i32, i32) {
    %c0_i32 = arith.constant 0 : i32
    %c0_i32_0 = arith.constant 0 : i32
    %c0_i32_1 = arith.constant 0 : i32
    return %arg0, %c0_i32, %c0_i32_0 : i32, i32, i32
  }
}

module attributes {stable_mosaic.version = 11 : i64} {
  func.func @_pass_b_kernel(%arg0: i32, %arg1: memref<2x4x128xbf16, #tpu.memory_space<vmem>>, %arg2: memref<64x256xbf16, #tpu.memory_space<vmem>>, %arg3: memref<64x4xbf16, #tpu.memory_space<vmem>>, %arg4: memref<64x1xf32, #tpu.memory_space<vmem>>, %arg5: memref<64x1xf32, #tpu.memory_space<vmem>>, %arg6: memref<64x1xf32, #tpu.memory_space<vmem>>, %arg7: memref<64x192xbf16, #tpu.memory_space<vmem>>, %arg8: memref<64x1xf32, #tpu.memory_space<vmem>>, %arg9: memref<2x64x128xf32, #tpu.memory_space<vmem>>) attributes {dimension_semantics = [#tpu.dimension_semantics<parallel>], iteration_bounds = array<i64: 1>, scalar_prefetch = 0 : i64, scratch_operands = 0 : i64, tpu.core_type = #tpu.core_type<tc>, window_params = [{transform_indices = @transform_0, window_bounds = array<i64: 2, 4, 128>}, {transform_indices = @transform_1, window_bounds = array<i64: 64, 256>}, {pipeline_mode = #tpu.pipeline_mode<synchronous>, transform_indices = @transform_2, window_bounds = array<i64: 64, 4>}, {pipeline_mode = #tpu.pipeline_mode<synchronous>, transform_indices = @transform_3, window_bounds = array<i64: 64, 1>}, {pipeline_mode = #tpu.pipeline_mode<synchronous>, transform_indices = @transform_4, window_bounds = array<i64: 64, 1>}, {pipeline_mode = #tpu.pipeline_mode<synchronous>, transform_indices = @transform_5, window_bounds = array<i64: 64, 1>}, {pipeline_mode = #tpu.pipeline_mode<synchronous>, transform_indices = @transform_6, window_bounds = array<i64: 64, 192>}, {pipeline_mode = #tpu.pipeline_mode<synchronous>, transform_indices = @transform_7, window_bounds = array<i64: 64, 1>}, {transform_indices = @transform_8, window_bounds = array<i64: 2, 64, 128>}]} {
    %c0 = arith.constant 0 : index
    %c0_0 = arith.constant 0 : index
    %c0_1 = arith.constant 0 : index
    %0 = vector.load %arg1[%c0, %c0_0, %c0_1] : memref<2x4x128xbf16, #tpu.memory_space<vmem>>, vector<1x4x128xbf16>
    %1 = vector.shape_cast %0 : vector<1x4x128xbf16> to vector<4x128xbf16>
    %c1 = arith.constant 1 : index
    %c0_2 = arith.constant 0 : index
    %c0_3 = arith.constant 0 : index
    %2 = vector.load %arg1[%c1, %c0_2, %c0_3] : memref<2x4x128xbf16, #tpu.memory_space<vmem>>, vector<1x4x128xbf16>
    %3 = vector.shape_cast %2 : vector<1x4x128xbf16> to vector<4x128xbf16>
    %4 = tpu.concatenate %1, %3 in 1 : vector<4x128xbf16>, vector<4x128xbf16> -> vector<4x256xbf16>
    %c0_4 = arith.constant 0 : index
    %c0_5 = arith.constant 0 : index
    %5 = vector.load %arg3[%c0_4, %c0_5] : memref<64x4xbf16, #tpu.memory_space<vmem>>, vector<64x4xbf16>
    %cst = arith.constant dense<0.000000e+00> : vector<64x256xf32>
    %6 = tpu.matmul %5, %4, %cst {dimension_numbers = #tpu.dot_dimension_numbers<[1], [0], [0], [1], [0, 0, 1, 1], [], []>} : vector<64x4xbf16>, vector<4x256xbf16>, vector<64x256xf32> -> vector<64x256xf32>
    %c0_6 = arith.constant 0 : index
    %c0_7 = arith.constant 0 : index
    %7 = vector.load %arg4[%c0_6, %c0_7] : memref<64x1xf32, #tpu.memory_space<vmem>>, vector<64x1xf32>
    %8 = vector.broadcast %7 : vector<64x1xf32> to vector<64x256xf32>
    %9 = arith.addf %6, %8 : vector<64x256xf32>
    %c0_8 = arith.constant 0 : index
    %c0_9 = arith.constant 0 : index
    %10 = vector.load %arg2[%c0_8, %c0_9] : memref<64x256xbf16, #tpu.memory_space<vmem>>, vector<64x256xbf16>
    %11 = arith.extf %10 : vector<64x256xbf16> to vector<64x256xf32>
    %c0_10 = arith.constant 0 : index
    %c0_11 = arith.constant 0 : index
    %12 = vector.load %arg5[%c0_10, %c0_11] : memref<64x1xf32, #tpu.memory_space<vmem>>, vector<64x1xf32>
    %13 = vector.broadcast %12 : vector<64x1xf32> to vector<64x256xf32>
    %14 = arith.mulf %11, %13 : vector<64x256xf32>
    %c0_12 = arith.constant 0 : index
    %c0_13 = arith.constant 0 : index
    %15 = vector.load %arg6[%c0_12, %c0_13] : memref<64x1xf32, #tpu.memory_space<vmem>>, vector<64x1xf32>
    %16 = vector.broadcast %15 : vector<64x1xf32> to vector<64x256xf32>
    %17 = arith.addf %14, %16 : vector<64x256xf32>
    %cst_14 = arith.constant 0.000000e+00 : f32
    %18 = vector.broadcast %cst_14 : f32 to vector<64x256xf32>
    %19 = arith.maximumf %17, %18 : vector<64x256xf32>
    %20 = arith.truncf %19 : vector<64x256xf32> to vector<64x256xbf16>
    %cst_15 = arith.constant 0.000000e+00 : bf16
    %21 = vector.broadcast %cst_15 : bf16 to vector<64x1xbf16>
    %22 = vector.extract_strided_slice %20 {offsets = [0, 0], sizes = [64, 255], strides = [1, 1]} : vector<64x256xbf16> to vector<64x255xbf16>
    %23 = tpu.concatenate %21, %22 in 1 : vector<64x1xbf16>, vector<64x255xbf16> -> vector<64x256xbf16>
    %24 = vector.extract_strided_slice %20 {offsets = [0, 1], sizes = [64, 255], strides = [1, 1]} : vector<64x256xbf16> to vector<64x255xbf16>
    %25 = tpu.concatenate %24, %21 in 1 : vector<64x255xbf16>, vector<64x1xbf16> -> vector<64x256xbf16>
    %26 = tpu.iota {dimensions = array<i32: 1>} : vector<1x256xi32>
    %c128_i32 = arith.constant 128 : i32
    %c0_i32 = arith.constant 0 : i32
    %27 = arith.cmpi eq, %c128_i32, %c0_i32 : i32
    %c1_i32 = arith.constant 1 : i32
    %28 = arith.select %27, %c1_i32, %c128_i32 : i32
    %29 = vector.broadcast %28 : i32 to vector<1x256xi32>
    %30 = arith.remsi %26, %29 : vector<1x256xi32>
    %c0_i32_16 = arith.constant 0 : i32
    %31 = vector.broadcast %c0_i32_16 : i32 to vector<1x256xi32>
    %32 = arith.cmpi ne, %30, %31 : vector<1x256xi32>
    %c0_i32_17 = arith.constant 0 : i32
    %33 = vector.broadcast %c0_i32_17 : i32 to vector<1x256xi32>
    %34 = arith.cmpi slt, %30, %33 : vector<1x256xi32>
    %c0_i32_18 = arith.constant 0 : i32
    %35 = arith.cmpi slt, %28, %c0_i32_18 : i32
    %36 = vector.broadcast %35 : i1 to vector<1x256xi1>
    %37 = vector.broadcast %36 : vector<1x256xi1> to vector<1x256xi1>
    %38 = arith.xori %34, %37 : vector<1x256xi1>
    %39 = arith.andi %38, %32 : vector<1x256xi1>
    %40 = vector.broadcast %28 : i32 to vector<1x256xi32>
    %41 = arith.addi %30, %40 : vector<1x256xi32>
    %42 = arith.select %39, %41, %30 : vector<1x256xi1>, vector<1x256xi32>
    %c0_i32_19 = arith.constant 0 : i32
    %43 = vector.broadcast %c0_i32_19 : i32 to vector<1x256xi32>
    %44 = arith.cmpi ne, %42, %43 : vector<1x256xi32>
    %cst_20 = arith.constant 0.000000e+00 : f32
    %45 = arith.truncf %cst_20 : f32 to bf16
    %46 = vector.shape_cast %44 : vector<1x256xi1> to vector<1x256xi1>
    %47 = vector.broadcast %46 : vector<1x256xi1> to vector<64x256xi1>
    %48 = vector.broadcast %45 : bf16 to vector<64x256xbf16>
    %49 = arith.select %47, %23, %48 : vector<64x256xi1>, vector<64x256xbf16>
    %c127_i32 = arith.constant 127 : i32
    %50 = vector.broadcast %c127_i32 : i32 to vector<1x256xi32>
    %51 = arith.cmpi ne, %42, %50 : vector<1x256xi32>
    %cst_21 = arith.constant 0.000000e+00 : f32
    %52 = arith.truncf %cst_21 : f32 to bf16
    %53 = vector.shape_cast %51 : vector<1x256xi1> to vector<1x256xi1>
    %54 = vector.broadcast %53 : vector<1x256xi1> to vector<64x256xi1>
    %55 = vector.broadcast %52 : bf16 to vector<64x256xbf16>
    %56 = arith.select %54, %25, %55 : vector<64x256xi1>, vector<64x256xbf16>
    %57 = tpu.concatenate %49, %20, %56 in 0 : vector<64x256xbf16>, vector<64x256xbf16>, vector<64x256xbf16> -> vector<192x256xbf16>
    %c0_22 = arith.constant 0 : index
    %c0_23 = arith.constant 0 : index
    %58 = vector.load %arg7[%c0_22, %c0_23] : memref<64x192xbf16, #tpu.memory_space<vmem>>, vector<64x192xbf16>
    %cst_24 = arith.constant dense<0.000000e+00> : vector<64x256xf32>
    %59 = tpu.matmul %58, %57, %cst_24 {dimension_numbers = #tpu.dot_dimension_numbers<[1], [0], [0], [1], [0, 0, 1, 1], [], []>} : vector<64x192xbf16>, vector<192x256xbf16>, vector<64x256xf32> -> vector<64x256xf32>
    %c0_25 = arith.constant 0 : index
    %c0_26 = arith.constant 0 : index
    %60 = vector.load %arg8[%c0_25, %c0_26] : memref<64x1xf32, #tpu.memory_space<vmem>>, vector<64x1xf32>
    %61 = vector.broadcast %60 : vector<64x1xf32> to vector<64x256xf32>
    %62 = arith.addf %59, %61 : vector<64x256xf32>
    %63 = arith.addf %9, %62 : vector<64x256xf32>
    %cst_27 = arith.constant 0.000000e+00 : f32
    %64 = vector.broadcast %cst_27 : f32 to vector<64x256xf32>
    %65 = arith.maximumf %63, %64 : vector<64x256xf32>
    %66 = vector.extract_strided_slice %65 {offsets = [0, 0], sizes = [64, 128], strides = [1, 1]} : vector<64x256xf32> to vector<64x128xf32>
    %c0_28 = arith.constant 0 : index
    %c0_29 = arith.constant 0 : index
    %c0_30 = arith.constant 0 : index
    %67 = vector.load %arg9[%c0_28, %c0_29, %c0_30] : memref<2x64x128xf32, #tpu.memory_space<vmem>>, vector<1x64x128xf32>
    %68 = vector.shape_cast %67 : vector<1x64x128xf32> to vector<64x128xf32>
    %69 = vector.shape_cast %66 : vector<64x128xf32> to vector<1x64x128xf32>
    tpu.vector_store %arg9[%c0_28, %c0_29, %c0_30], %69 {strides = array<i32>} : memref<2x64x128xf32, #tpu.memory_space<vmem>>, vector<1x64x128xf32>,
    %70 = vector.extract_strided_slice %65 {offsets = [0, 128], sizes = [64, 128], strides = [1, 1]} : vector<64x256xf32> to vector<64x128xf32>
    %c1_31 = arith.constant 1 : index
    %c0_32 = arith.constant 0 : index
    %c0_33 = arith.constant 0 : index
    %71 = vector.load %arg9[%c1_31, %c0_32, %c0_33] : memref<2x64x128xf32, #tpu.memory_space<vmem>>, vector<1x64x128xf32>
    %72 = vector.shape_cast %71 : vector<1x64x128xf32> to vector<64x128xf32>
    %73 = vector.shape_cast %70 : vector<64x128xf32> to vector<1x64x128xf32>
    tpu.vector_store %arg9[%c1_31, %c0_32, %c0_33], %73 {strides = array<i32>} : memref<2x64x128xf32, #tpu.memory_space<vmem>>, vector<1x64x128xf32>,
    return
  }
  func.func @transform_0(%arg0: i32) -> (i32, i32, i32) {
    %c0_i32 = arith.constant 0 : i32
    %c0_i32_0 = arith.constant 0 : i32
    %c0_i32_1 = arith.constant 0 : i32
    return %arg0, %c0_i32, %c0_i32_0 : i32, i32, i32
  }
  func.func @transform_1(%arg0: i32) -> (i32, i32) {
    %c0_i32 = arith.constant 0 : i32
    %c0_i32_0 = arith.constant 0 : i32
    return %c0_i32, %arg0 : i32, i32
  }
  func.func @transform_2(%arg0: i32) -> (i32, i32) {
    %c0_i32 = arith.constant 0 : i32
    %c0_i32_0 = arith.constant 0 : i32
    %c0_i32_1 = arith.constant 0 : i32
    return %c0_i32, %c0_i32_0 : i32, i32
  }
  func.func @transform_3(%arg0: i32) -> (i32, i32) {
    %c0_i32 = arith.constant 0 : i32
    %c0_i32_0 = arith.constant 0 : i32
    %c0_i32_1 = arith.constant 0 : i32
    return %c0_i32, %c0_i32_0 : i32, i32
  }
  func.func @transform_4(%arg0: i32) -> (i32, i32) {
    %c0_i32 = arith.constant 0 : i32
    %c0_i32_0 = arith.constant 0 : i32
    %c0_i32_1 = arith.constant 0 : i32
    return %c0_i32, %c0_i32_0 : i32, i32
  }
  func.func @transform_5(%arg0: i32) -> (i32, i32) {
    %c0_i32 = arith.constant 0 : i32
    %c0_i32_0 = arith.constant 0 : i32
    %c0_i32_1 = arith.constant 0 : i32
    return %c0_i32, %c0_i32_0 : i32, i32
  }
  func.func @transform_6(%arg0: i32) -> (i32, i32) {
    %c0_i32 = arith.constant 0 : i32
    %c0_i32_0 = arith.constant 0 : i32
    %c0_i32_1 = arith.constant 0 : i32
    return %c0_i32, %c0_i32_0 : i32, i32
  }
  func.func @transform_7(%arg0: i32) -> (i32, i32) {
    %c0_i32 = arith.constant 0 : i32
    %c0_i32_0 = arith.constant 0 : i32
    %c0_i32_1 = arith.constant 0 : i32
    return %c0_i32, %c0_i32_0 : i32, i32
  }
  func.func @transform_8(%arg0: i32) -> (i32, i32, i32) {
    %c0_i32 = arith.constant 0 : i32
    %c0_i32_0 = arith.constant 0 : i32
    %c0_i32_1 = arith.constant 0 : i32
    return %arg0, %c0_i32, %c0_i32_0 : i32, i32, i32
  }
}

</mosaic_0001>

<bundles_post_ra>
// kernel: rrb_forward.2
= control target key start
LH: loop header
LB: loop body
LE: loop exit
PB: predicated region body
PF: predicated region fallthrough
CT: control target
= control target key end

     0   :  { %vm23_vm0 = vcmask 1041408   ;;  %v602_v2 = vmov 0   ;;  %s603_s19 = smov 1   ;;  %s604_s20 = smov 127   ;;  %v54_v13 = vlaneseq  ;;  %vm47_vm7 = vcmask 1039360   ;;  %s756_s0 = inlined_call_operand.vmem [shape: bf16[2,4,128], index: 0, kind: input, shape index: {}]   ;;  %s757_s1 = inlined_call_operand.vmem [shape: bf16[64,15], index: 1, kind: input, shape index: {}]   ;;  %s758_s2 = inlined_call_operand.vmem [shape: f32[64,1], index: 2, kind: input, shape index: {}]   ;;  %s759_s3 = inlined_call_operand.vmem [shape: bf16[64,256], index: 3, kind: output, shape index: {0}]   ;;  %s760_s4 = inlined_call_operand.vmem [shape: f32[1,2,64], index: 4, kind: output, shape index: {1}]  }
   0x1   :  { %v565_v0 = vld [vmem:[%s756_s0 + $0x2] sm:$0x3]  ;;  %v20_v1 = vld [vmem:[%s756_s0] sm:$0x3]  ;;  %282 = vmatprep.mubr.bf16.mxu0 %v602_v2  ;;  %302 = vmatprep.mubr.bf16.mxu1 %v602_v2  ;;  %v162_v5 = vld [vmem:[%s758_s2 + $0x8] sm:$0xff]  ;;  %vm242_vm8 = vcmask 1046528  }
   0x2   :  { %v28_v3 = vsel %vm23_vm0, %v565_v0, 1065369472  ;;  %597 = vset.pattern.permute.xlu1 %v602_v2  ;;  %596 = vset.pattern.permute.xlu0 %v602_v2  ;;  %v26_v4 = vsel %vm23_vm0, %v20_v1, 1065369472  ;;  %v161_v6 = vld [vmem:[%s758_s2] sm:$0xff]  ;;  %v163_v7 = vld [vmem:[%s758_s2 + $0x10] sm:$0xff] }
   0x3   :  { %33 = vrot.lane.b32.xlu1 %v28_v3, %s603_s19  ;;  %45 = vrot.lane.b32.xlu0 %v28_v3, %s604_s20  ;;  %v164_v8 = vld [vmem:[%s758_s2 + $0x18] sm:$0xff]  ;;  %v165_v9 = vld [vmem:[%s758_s2 + $0x20] sm:$0xff]  ;;  %v665_v14 = vand.u32 127, %v54_v13  ;;  %v669_v17 = vshrl.u32 %v54_v13, 7  ;;  %v128_v19 = vshrl.u32 %v28_v3, 16  ;;  %v131_v21 = vshll.u32 %v28_v3, 16 }
   0x4   :  { %v166_v10 = vld [vmem:[%s758_s2 + $0x28] sm:$0xff]  ;;  %v167_v11 = vld [vmem:[%s758_s2 + $0x30] sm:$0xff]  ;;  %v168_v12 = vld [vmem:[%s758_s2 + $0x38] sm:$0xff]  ;;  %v121_v22 = vshrl.u32 %v26_v4, 16  ;;  %v124_v23 = vshll.u32 %v26_v4, 16  ;;  %vm35_vm10 = vcmask 7168  }
   0x5   :  { %v56_v15 = vadd.s32 128, %v665_v14  ;;  %vm101_vm1 = vcmp.ne.s32.totalorder %v665_v14, 127  ;;  %vm81_vm4 = vcmp.ne.s32.totalorder %v665_v14, 0  ;;  %v95_v18 = vsub.s32 4, %v669_v17  ;;  %v598_v59 = vld [vmem:[%s757_s1] sm:$0xff]   ;;  %v599_v60 = vld [vmem:[%s757_s1 + $0x10] sm:$0xff]  }
   0x6   :  { %v91_v24 = vsub.s32 0, %v669_v17  ;;  %v130_v27 = vrot.slane %v128_v19, 5  ;;  %v133_v28 = vrot.slane %v131_v21, 6  ;;  %v123_v29 = vrot.slane %v121_v22, 5  ;;  %v600_v61 = vld [vmem:[%s757_s1 + $0x8] sm:$0xff]   ;;  %v601_v62 = vld [vmem:[%s757_s1 + $0x18] sm:$0xff]  }
   0x7   :  { %43 = vrot.lane.b32.xlu1 %v26_v4, %s604_s20  ;;  %31 = vrot.lane.b32.xlu0 %v26_v4, %s603_s19  ;;  %v68_v16 = vand.u32 127, %v56_v15  ;;  %v126_v30 = vrot.slane %v124_v23, 6  ;;  %vm141_vm11 = vcmask 1042432   ;;  %vm142_vm12 = vsmask.f32 2304 }
   0x8   :  { %v134_v37 = vor.u32 %v133_v28, %v130_v27  ;;  %vm243_vm13 = vcmask 1047552   ;;  %v605_v38 = vmov 65535  }
   0x9   :  { %vm102_vm2 = vcmp.ne.s32.totalorder %v68_v16, 127  ;;  %vm82_vm5 = vcmp.ne.s32.totalorder %v68_v16, 0  ;;  %v244_v39 = vsel %vm242_vm8, 4294967295, %v605_v38  ;;  %v127_v40 = vor.u32 %v126_v30, %v123_v29 }
   0xa   :  { %vm107_vm3 = vmpackc.low %vm102_vm2, %vm101_vm1  ;;  %vm146_vm2 = vcmask 1044480   ;;  %v245_v47 = vsel %vm243_vm13, %v244_v39, 0  ;;  %vm488_vm8 = vcmask 392512  }
   0xb   :  { %176 = vperm.xlu1 %597, %v162_v5   ;;  %171 = vperm.xlu0 %596, %v161_v6   ;;  %v108_v20 = vsel %vm107_vm3, 65537, %v602_v2  ;;  %vm87_vm6 = vmpackc.low %vm82_vm5, %vm81_vm4  ;;  %vm229_vm3 = vcmask 121856   ;;  %vm460_vm4 = vcmask 130112   ;;  %vm467_vm5 = vcmask 195712  }
   0xc   :  { %v116_v25 = vrot.slane %v108_v20, %v95_v18  ;;  %v88_v26 = vsel %vm87_vm6, 65537, %v602_v2  ;;  %v112_v31 = vrot.slane %v108_v20, %v91_v24  ;;  %vm143_vm1 = vmand %vm141_vm11, %vm142_vm12  ;;  %vm474_vm6 = vcmask 261312  }
   0xd   :  { %v92_v32 = vrot.slane %v88_v26, %v91_v24  ;;  %v96_v33 = vrot.slane %v88_v26, %v95_v18  ;;  %vm553_vm11 = vcmask 1040384   ;;  %vm555_vm12 = vcmask 517120  }
   0xe   :  { %vm118_vm9 = vcmp.ne.s16.totalorder %v116_v25, 0  ;;  %vm117_vm14 = vcmp.ne.s16.totalorder %v112_v31, 0 }
   0xf   :  { %181 = vperm.xlu1 %597, %v163_v7   ;;  %186 = vperm.xlu0 %596, %v164_v8   ;;  %vm97_vm15 = vcmp.ne.s16.totalorder %v92_v32, 0  ;;  %vm98_vm0 = vcmp.ne.s16.totalorder %v96_v33, 0 }
  0x13   :  { %191 = vperm.xlu1 %597, %v165_v9   ;;  %196 = vperm.xlu0 %596, %v166_v10  }
  0x17   :  { %201 = vperm.xlu1 %597, %v167_v11   ;;  %206 = vperm.xlu0 %596, %v168_v12  }
  0x75   :  { %v34_v34 = vpop.permute.xlu1 %33  ;;  %v46_v35 = vpop.permute.xlu0 %45 }
  0x76   :  { %v52_v36 = vsel %vm47_vm7, %v46_v35, 0 }
  0x77   :  { %v120_v41 = vsel %vm118_vm9, %v52_v36, 0  ;;  %vm495_vm9 = vcmask 458112  }
  0x78   :  { %v140_v48 = vrot.slane %v120_v41, 3 }
  0x79   :  { %v44_v42 = vpop.permute.xlu1 %43  ;;  %v32_v43 = vpop.permute.xlu0 %31 }
  0x7a   :  { %v48_v44 = vsel %vm47_vm7, %v44_v42, %v46_v35  ;;  %v36_v45 = vsel %vm35_vm10, %v32_v43, %v34_v34  ;;  %v41_v46 = vsel %vm35_vm10, 0, %v32_v43  ;;  %vm481_vm7 = vcmask 326912  }
  0x7b   :  { %v119_v49 = vsel %vm117_vm14, %v48_v44, 0  ;;  %v99_v50 = vsel %vm97_vm15, %v41_v46, 0  ;;  %v100_v51 = vsel %vm98_vm0, %v36_v45, 0  ;;  %vm502_vm10 = vcmask 523712  }
  0x7c   :  { %v139_v52 = vrot.slane %v119_v49, 3  ;;  %v145_v53 = vsel %vm143_vm1, %v100_v51, %v134_v37  ;;  %v144_v54 = vsel %vm143_vm1, %v99_v50, %v127_v40 }
  0x7d   :  { %v152_v55 = vsel %vm146_vm2, %v145_v53, %v140_v48 }
  0x7e   :  { %v248_v56 = vand.u32 %v245_v47, %v152_v55  ;;  %v149_v57 = vsel %vm146_vm2, %v144_v54, %v139_v52 }
  0x7f   :  { %v246_v58 = vand.u32 %v245_v47, %v149_v57 }
  0x80   :  { %264 = vmatprep.subr.bf16.mxu0 %v248_v56  ;;  %590 = vmatprep.subr.bf16.mxu1 %v248_v56 }
  0x81   :  { %265 = vmatpush1.bf16.msra.mxu0 %v246_v58  ;;  %591 = vmatpush1.bf16.msra.mxu1 %v246_v58 }
  0x84   :  { %570 = vmatmul.mubr.msk.bf16.vlgmr.msra.gmra.mxu0 %vm229_vm3, %v598_v59  ;;  %572 = vmatmul.mubr.msk.bf16.vlgmr.msra.gmra.mxu1 %vm229_vm3, %v599_v60 }
  0x85   :  { %292 = vmatprep.mubr.bf16.mxu0 %v602_v2  ;;  %312 = vmatprep.mubr.bf16.mxu1 %v602_v2 }
  0x86   :  { %v177_v63 = vpop.permute.xlu1 %176  ;;  %v172_v0 = vpop.permute.xlu0 %171 }
  0x8a   :  { %v182_v1 = vpop.permute.xlu1 %181  ;;  %v694_v3 = vpop.permute.xlu0 %186 }
  0x8c   :  { %571 = vmatmul.mubr.msk.bf16.gmra.mxu0 %vm229_vm3, %v600_v61  ;;  %573 = vmatmul.mubr.msk.bf16.gmra.mxu1 %vm229_vm3, %v601_v62 }
  0x8e   :  { %v192_v6 = vpop.permute.xlu1 %191  ;;  %v197_v15 = vpop.permute.xlu0 %196 }
  0x92   :  { %v202_v33 = vpop.permute.xlu1 %201  ;;  %v207_v48 = vpop.permute.xlu0 %206 }
 0x144   :  { %v284_v4 = vpop.f32.mrf.mxu0  ;;  %v304_v5 = vpop.f32.mrf.mxu1 }
 0x145   :  { %v285_v8 = vadd.f32 %v284_v4, %v172_v0  ;;  %v305_v9 = vadd.f32 %v304_v5, %v192_v6 }
 0x146   :  { %v286_v7 = vpop.f32.mrf.mxu0  ;;  %v306_v2 = vpop.f32.mrf.mxu1 }
 0x147   :  { %v287_v10 = vadd.f32 %v286_v7, %v172_v0  ;;  %v307_v11 = vadd.f32 %v306_v2, %v192_v6  ;;  %v403_v31 = vmul.f32 %v285_v8, %v285_v8  ;;  %v411_v32 = vmul.f32 %v305_v9, %v305_v9 }
 0x148   :  { %v288_v12 = vpop.f32.mrf.mxu0  ;;  %v308_v13 = vpop.f32.mrf.mxu1 }
 0x149   :  { %v582_v16 = vpack.c.bf16 %v287_v10, %v285_v8  ;;  %v586_v18 = vpack.c.bf16 %v307_v11, %v305_v9  ;;  %v391_v21 = vadd.f32 %v307_v11, %v305_v9  ;;  %v379_v22 = vadd.f32 %v287_v10, %v285_v8 }
 0x14a   :  { %v290_v19 = vpop.f32.mrf.mxu0  ;;  %v310_v20 = vpop.f32.mrf.mxu1  ;;  %v404_v23 = vmul.f32 %v287_v10, %v287_v10  ;;  %v412_v24 = vmul.f32 %v307_v11, %v307_v11  ;;  %v289_v25 = vadd.f32 %v288_v12, %v177_v63  ;;  %v309_v26 = vadd.f32 %v308_v13, %v197_v15 }
 0x14b   :  { %371 = vst [vmem:[%s759_s3] sm:$0xff] %v582_v16  ;;  %375 = vst [vmem:[%s759_s3 + $0x20] sm:$0xff] %v586_v18  ;;  %v291_v27 = vadd.f32 %v290_v19, %v177_v63  ;;  %v311_v28 = vadd.f32 %v310_v20, %v197_v15  ;;  %392 = vadd.xlane.f32.xlu0 %v391_v21  ;;  %380 = vadd.xlane.f32.xlu1 %v379_v22 }
 0x14c   :  { %v294_v29 = vpop.f32.mrf.mxu0  ;;  %v314_v30 = vpop.f32.mrf.mxu1  ;;  %v419_v38 = vadd.f32 %v404_v23, %v403_v31  ;;  %v431_v39 = vadd.f32 %v412_v24, %v411_v32  ;;  %v405_v47 = vmul.f32 %v289_v25, %v289_v25  ;;  %v413_v60 = vmul.f32 %v309_v26, %v309_v26 }
 0x14d   :  { %v583_v34 = vpack.c.bf16 %v291_v27, %v289_v25  ;;  %v587_v35 = vpack.c.bf16 %v311_v28, %v309_v26  ;;  %v406_v40 = vmul.f32 %v291_v27, %v291_v27  ;;  %v295_v41 = vadd.f32 %v294_v29, %v182_v1 }
 0x14e   :  { %v296_v36 = vpop.f32.mrf.mxu0  ;;  %v316_v37 = vpop.f32.mrf.mxu1  ;;  %v315_v42 = vadd.f32 %v314_v30, %v202_v33  ;;  %v382_v53 = vadd.f32 %v291_v27, %v289_v25  ;;  %v414_v55 = vmul.f32 %v311_v28, %v311_v28  ;;  %v394_v63 = vadd.f32 %v311_v28, %v309_v26 }
 0x14f   :  { %372 = vst [vmem:[%s759_s3 + $0x8] sm:$0xff] %v583_v34  ;;  %376 = vst [vmem:[%s759_s3 + $0x28] sm:$0xff] %v587_v35  ;;  %v297_v43 = vadd.f32 %v296_v36, %v182_v1  ;;  %v317_v44 = vadd.f32 %v316_v37, %v202_v33  ;;  %420 = vadd.xlane.f32.xlu0 %v419_v38  ;;  %432 = vadd.xlane.f32.xlu1 %v431_v39  ;;  %v455_v27 = vadd.s32 4294967288, %v665_v14 }
 0x150   :  { %v298_v45 = vpop.f32.mrf.mxu0  ;;  %v318_v46 = vpop.f32.mrf.mxu1  ;;  %v422_v54 = vadd.f32 %v406_v40, %v405_v47  ;;  %v434_v0 = vadd.f32 %v414_v55, %v413_v60  ;;  %v415_v7 = vmul.f32 %v315_v42, %v315_v42  ;;  %v462_v28 = vadd.s32 4294967280, %v665_v14 }
 0x151   :  { %v584_v49 = vpack.c.bf16 %v297_v43, %v295_v41  ;;  %v588_v50 = vpack.c.bf16 %v317_v44, %v315_v42  ;;  %v299_v56 = vadd.f32 %v298_v45, %v694_v3  ;;  %v319_v57 = vadd.f32 %v318_v46, %v207_v48 }
 0x152   :  { %v300_v51 = vpop.f32.mrf.mxu0  ;;  %v320_v52 = vpop.f32.mrf.mxu1  ;;  %v408_v1 = vmul.f32 %v297_v43, %v297_v43  ;;  %v385_v4 = vadd.f32 %v297_v43, %v295_v41  ;;  %v416_v6 = vmul.f32 %v317_v44, %v317_v44  ;;  %v397_v2 = vadd.f32 %v317_v44, %v315_v42 }
 0x153   :  { %373 = vst [vmem:[%s759_s3 + $0x10] sm:$0xff] %v584_v49  ;;  %377 = vst [vmem:[%s759_s3 + $0x30] sm:$0xff] %v588_v50  ;;  %v301_v58 = vadd.f32 %v300_v51, %v694_v3  ;;  %v321_v59 = vadd.f32 %v320_v52, %v207_v48  ;;  %383 = vadd.xlane.f32.xlu0 %v382_v53  ;;  %423 = vadd.xlane.f32.xlu1 %v422_v54  ;;  %v476_v29 = vadd.s32 4294967264, %v665_v14 }
 0x154   :  { %v407_v3 = vmul.f32 %v295_v41, %v295_v41  ;;  %v437_v8 = vadd.f32 %v416_v6, %v415_v7  ;;  %v409_v10 = vmul.f32 %v299_v56, %v299_v56  ;;  %v417_v15 = vmul.f32 %v319_v57, %v319_v57 }
 0x155   :  { %v585_v61 = vpack.c.bf16 %v301_v58, %v299_v56  ;;  %v589_v62 = vpack.c.bf16 %v321_v59, %v319_v57  ;;  %v410_v9 = vmul.f32 %v301_v58, %v301_v58  ;;  %v388_v11 = vadd.f32 %v301_v58, %v299_v56 }
 0x156   :  { %v425_v5 = vadd.f32 %v408_v1, %v407_v3  ;;  %v418_v13 = vmul.f32 %v321_v59, %v321_v59  ;;  %v400_v16 = vadd.f32 %v321_v59, %v319_v57  ;;  %v483_v30 = vadd.s32 4294967256, %v665_v14 }
 0x157   :  { %374 = vst [vmem:[%s759_s3 + $0x18] sm:$0xff] %v585_v61  ;;  %378 = vst [vmem:[%s759_s3 + $0x38] sm:$0xff] %v589_v62  ;;  %395 = vadd.xlane.f32.xlu0 %v394_v63  ;;  %435 = vadd.xlane.f32.xlu1 %v434_v0  ;;  %v428_v12 = vadd.f32 %v410_v9, %v409_v10  ;;  %v458_v33 = vsub.s32 %v455_v27, %v669_v17  ;;  %v469_v34 = vadd.s32 4294967272, %v665_v14 }
 0x158   :  { %v440_v18 = vadd.f32 %v418_v13, %v417_v15  ;;  %v465_v35 = vsub.s32 %v462_v28, %v669_v17  ;;  %v490_v36 = vadd.s32 4294967248, %v665_v14  ;;  %v453_v37 = vsub.s32 %v665_v14, %v669_v17 }
 0x159   :  { %v497_v38 = vadd.s32 4294967240, %v665_v14  ;;  %v479_v39 = vsub.s32 %v476_v29, %v669_v17  ;;  %v486_v40 = vsub.s32 %v483_v30, %v669_v17  ;;  %v472_v45 = vsub.s32 %v469_v34, %v669_v17 }
 0x15a   :  { %v493_v48 = vsub.s32 %v490_v36, %v669_v17 }
 0x15b   :  { %386 = vadd.xlane.f32.xlu0 %v385_v4  ;;  %426 = vadd.xlane.f32.xlu1 %v425_v5  ;;  %v500_v14 = vsub.s32 %v497_v38, %v669_v17 }
 0x15f   :  { %398 = vadd.xlane.f32.xlu0 %v397_v2  ;;  %438 = vadd.xlane.f32.xlu1 %v437_v8 }
 0x163   :  { %389 = vadd.xlane.f32.xlu0 %v388_v11  ;;  %429 = vadd.xlane.f32.xlu1 %v428_v12 }
 0x167   :  { %401 = vadd.xlane.f32.xlu0 %v400_v16  ;;  %441 = vadd.xlane.f32.xlu1 %v440_v18 }
 0x1d4   :  { %v393_v19 = vpop.xlane.xlu0 %392  ;;  %v381_v20 = vpop.xlane.xlu1 %380 }
 0x1d5   :  { %v454_v49 = vrot.slane %v381_v20, %v453_v37  ;;  %v480_v57 = vrot.slane %v393_v19, %v479_v39 }
 0x1d8   :  { %v421_v21 = vpop.xlane.xlu0 %420  ;;  %v433_v22 = vpop.xlane.xlu1 %432 }
 0x1d9   :  { %v516_v50 = vrot.slane %v421_v21, %v453_v37  ;;  %v535_v58 = vrot.slane %v433_v22, %v479_v39 }
 0x1dc   :  { %v384_v23 = vpop.xlane.xlu0 %383  ;;  %v424_v24 = vpop.xlane.xlu1 %423 }
 0x1dd   :  { %v459_v43 = vrot.slane %v384_v23, %v458_v33  ;;  %v520_v44 = vrot.slane %v424_v24, %v458_v33 }
 0x1df   :  { %v461_v53 = vsel %vm460_vm4, %v459_v43, %v454_v49  ;;  %v521_v54 = vsel %vm460_vm4, %v520_v44, %v516_v50 }
 0x1e0   :  { %v396_v25 = vpop.xlane.xlu0 %395  ;;  %v436_v26 = vpop.xlane.xlu1 %435 }
 0x1e1   :  { %v487_v61 = vrot.slane %v396_v25, %v486_v40  ;;  %v540_v17 = vrot.slane %v436_v26, %v486_v40 }
 0x1e4   :  { %v387_v31 = vpop.xlane.xlu0 %386  ;;  %v427_v32 = vpop.xlane.xlu1 %426 }
 0x1e5   :  { %v466_v46 = vrot.slane %v387_v31, %v465_v35  ;;  %v525_v47 = vrot.slane %v427_v32, %v465_v35 }
 0x1e7   :  { %v468_v59 = vsel %vm467_vm5, %v466_v46, %v461_v53  ;;  %v526_v60 = vsel %vm467_vm5, %v525_v47, %v521_v54 }
 0x1e8   :  { %v399_v41 = vpop.xlane.xlu0 %398  ;;  %v439_v42 = vpop.xlane.xlu1 %438 }
 0x1e9   :  { %v494_v0 = vrot.slane %v399_v41, %v493_v48  ;;  %v545_v1 = vrot.slane %v439_v42, %v493_v48 }
 0x1ec   :  { %v390_v51 = vpop.xlane.xlu0 %389  ;;  %v430_v52 = vpop.xlane.xlu1 %429 }
 0x1ed   :  { %v473_v55 = vrot.slane %v390_v51, %v472_v45  ;;  %v530_v56 = vrot.slane %v430_v52, %v472_v45 }
 0x1ef   :  { %v475_v62 = vsel %vm474_vm6, %v473_v55, %v468_v59  ;;  %v531_v63 = vsel %vm474_vm6, %v530_v56, %v526_v60 }
 0x1f0   :  { %v482_v3 = vsel %vm481_vm7, %v480_v57, %v475_v62  ;;  %v536_v4 = vsel %vm481_vm7, %v535_v58, %v531_v63  ;;  %v402_v5 = vpop.xlane.xlu0 %401  ;;  %v442_v6 = vpop.xlane.xlu1 %441 }
 0x1f1   :  { %v489_v7 = vsel %vm488_vm8, %v487_v61, %v482_v3  ;;  %v501_v2 = vrot.slane %v402_v5, %v500_v14  ;;  %v541_v8 = vsel %vm488_vm8, %v540_v17, %v536_v4  ;;  %v550_v9 = vrot.slane %v442_v6, %v500_v14 }
 0x1f2   :  { %v496_v10 = vsel %vm495_vm9, %v494_v0, %v489_v7  ;;  %v546_v11 = vsel %vm495_vm9, %v545_v1, %v541_v8 }
 0x1f3   :  { %v503_v12 = vsel %vm502_vm10, %v501_v2, %v496_v10  ;;  %v551_v13 = vsel %vm502_vm10, %v550_v9, %v546_v11 }
 0x1f4   :  { %v554_v15 = vsel %vm553_vm11, %v503_v12, %v551_v13 }
 0x1f5   :  { %556 = vst.msk [vmem:[%s760_s4] sm:$0x3] %vm555_vm12, %v554_v15 }

// kernel: rrb_forward.3
= control target key start
LH: loop header
LB: loop body
LE: loop exit
PB: predicated region body
PF: predicated region fallthrough
CT: control target
= control target key end

     0   :  { %v888_v2 = vmov 0   ;;  %vm125_vm0 = vcmask 1041408   ;;  %vm112_vm1 = vcmask 31744   ;;  %s1222_s0 = inlined_call_operand.vmem [shape: bf16[2,4,128], index: 0, kind: input, shape index: {}]   ;;  %s1223_s1 = inlined_call_operand.vmem [shape: bf16[64,256], index: 1, kind: input, shape index: {}]   ;;  %s1224_s2 = inlined_call_operand.vmem [shape: bf16[64,4], index: 2, kind: input, shape index: {}]   ;;  %s1225_s3 = inlined_call_operand.vmem [shape: f32[64,1], index: 3, kind: input, shape index: {}]   ;;  %s1226_s4 = inlined_call_operand.vmem [shape: f32[64,1], index: 4, kind: input, shape index: {}]   ;;  %s1227_s5 = inlined_call_operand.vmem [shape: f32[64,1], index: 5, kind: input, shape index: {}]   ;;  %s1228_s6 = inlined_call_operand.vmem [shape: bf16[64,192], index: 6, kind: input, shape index: {}]   ;;  %s1229_s7 = inlined_call_operand.vmem [shape: f32[64,1], index: 7, kind: input, shape index: {}]   ;;  %s1230_s8 = inlined_call_operand.hbm [shape: f32[2,64,128], index: 8, kind: output, shape index: {}]  }
   0x1   :  { %v299_v0 = vld [vmem:[%s1227_s5 + $0x30] sm:$0xff]  ;;  %849 = vset.pattern.permute.xlu1 %v888_v2  ;;  %848 = vset.pattern.permute.xlu0 %v888_v2  ;;  %v300_v3 = vld [vmem:[%s1227_s5 + $0x38] sm:$0xff]  ;;  %v234_v5 = vld [vmem:[%s1226_s4 + $0x28] sm:$0xff] }
   0x2   :  { %v235_v1 = vld [vmem:[%s1226_s4 + $0x30] sm:$0xff]  ;;  %333 = vperm.xlu1 %849, %v299_v0   ;;  %v236_v4 = vld [vmem:[%s1226_s4 + $0x38] sm:$0xff]  ;;  %164 = vmatprep.mubr.bf16.mxu0 %v888_v2  ;;  %v788_v6 = vld [vmem:[%s1222_s0 + $0x2] sm:$0x3] }
   0x3   :  { %269 = vperm.xlu0 %848, %v235_v1   ;;  %v33_v7 = vld [vmem:[%s1222_s0] sm:$0x3]  ;;  %793 = vmatprep.subr.msk.bf16.mxu0 %vm125_vm0, %v788_v6  ;;  %v298_v11 = vld [vmem:[%s1227_s5 + $0x28] sm:$0xff] }
   0x4   :  { %v233_v8 = vld [vmem:[%s1226_s4 + $0x20] sm:$0xff]  ;;  %v127_v9 = vsel %vm125_vm0, %v33_v7, 0 }
   0x5   :  { %v850_v10 = vld [vmem:[%s1224_s2] sm:$0xff]   ;;  %147 = vmatpush1.bf16.msra.mxu0 %v127_v9 }
   0x6   :  { %338 = vperm.xlu1 %849, %v300_v3   ;;  %v297_v12 = vld [vmem:[%s1227_s5 + $0x20] sm:$0xff] }
   0x7   :  { %274 = vperm.xlu0 %848, %v236_v4  }
   0x8   :  { %794 = vmatmul.mubr.msk.bf16.vlgmr.msra.gmra.mxu0 %vm112_vm1, %v850_v10 }
   0x9   :  { %174 = vmatprep.mubr.bf16.mxu0 %v888_v2 }
   0xa   :  { %264 = vperm.xlu1 %849, %v234_v5  }
   0xb   :  { %259 = vperm.xlu0 %848, %v233_v8  }
   0xe   :  { %328 = vperm.xlu1 %849, %v298_v11  }
   0xf   :  { %323 = vperm.xlu0 %848, %v297_v12  }
  0x10   :  { %13 = vsyncpa [#allocation3], 0  ;;  %v232_v13 = vld [vmem:[%s1226_s4 + $0x18] sm:$0xff]  ;;  %v231_v14 = vld [vmem:[%s1226_s4 + $0x10] sm:$0xff]  ;;  %s889_s12 = smov 1   ;;  %vm637_vm2 = vcmask 523264  }
  0x11   :  { %v851_v15 = vld [vmem:[%s1224_s2 + $0x8] sm:$0xff]   ;;  %v296_v16 = vld [vmem:[%s1227_s5 + $0x18] sm:$0xff]  ;;  %v295_v17 = vld [vmem:[%s1227_s5 + $0x10] sm:$0xff]  ;;  %vm405_vm6 = vcmask 7168   ;;  %vm444_vm12 = vcmask 1039360  }
  0x12   :  { %254 = vperm.xlu1 %849, %v232_v13   ;;  %795 = vmatmul.mubr.msk.bf16.gmra.mxu0 %vm112_vm1, %v851_v15  ;;  %v230_v18 = vld [vmem:[%s1226_s4 + $0x8] sm:$0xff]  ;;  %v229_v19 = vld [vmem:[%s1226_s4] sm:$0xff]  ;;  %v852_v20 = vld [vmem:[%s1224_s2 + $0x10] sm:$0xff]  }
  0x13   :  { %249 = vperm.xlu0 %848, %v231_v14   ;;  %184 = vmatprep.mubr.bf16.mxu0 %v888_v2  ;;  %v294_v21 = vld [vmem:[%s1227_s5 + $0x8] sm:$0xff]  ;;  %v293_v22 = vld [vmem:[%s1227_s5] sm:$0xff]  ;;  %v853_v23 = vld [vmem:[%s1224_s2 + $0x18] sm:$0xff]  }
  0x14   :  { %v211_v24 = vld [vmem:[%s1223_s1 + $0x30] sm:$0xff]  ;;  %v212_v27 = vld [vmem:[%s1223_s1 + $0x38] sm:$0xff]  ;;  %v210_v34 = vld [vmem:[%s1223_s1 + $0x28] sm:$0xff] }
  0x15   :  { %v225_v25 = vunpack.c.l.bf16 %v211_v24  ;;  %v226_v26 = vunpack.c.h.bf16 %v211_v24  ;;  %v227_v32 = vunpack.c.l.bf16 %v212_v27  ;;  %v228_v33 = vunpack.c.h.bf16 %v212_v27  ;;  %v209_v37 = vld [vmem:[%s1223_s1 + $0x20] sm:$0xff]  ;;  %v208_v60 = vld [vmem:[%s1223_s1 + $0x18] sm:$0xff]  ;;  %v207_v61 = vld [vmem:[%s1223_s1 + $0x10] sm:$0xff] }
  0x16   :  { %318 = vperm.xlu1 %849, %v296_v16   ;;  %v223_v42 = vunpack.c.l.bf16 %v210_v34  ;;  %v224_v43 = vunpack.c.h.bf16 %v210_v34  ;;  %v221_v46 = vunpack.c.l.bf16 %v209_v37  ;;  %v222_v47 = vunpack.c.h.bf16 %v209_v37 }
  0x17   :  { %313 = vperm.xlu0 %848, %v295_v17   ;;  %v219_v5 = vunpack.c.l.bf16 %v208_v60  ;;  %v220_v6 = vunpack.c.h.bf16 %v208_v60  ;;  %v217_v7 = vunpack.c.l.bf16 %v207_v61  ;;  %v218_v8 = vunpack.c.h.bf16 %v207_v61  ;;  %v859_v60 = vld [vmem:[%s1228_s6 + $0x14] ss:$8 sps:$4 sm:$0xff]  }
  0x18   :  { %815 = vmatprep.mubr.msk.bf16.mxu1 %vm637_vm2, %v859_v60  ;;  %v47_v61 = vld [vmem:[%s1225_s3 + $0x18] sm:$0xff] }
  0x1a   :  { %244 = vperm.xlu1 %849, %v230_v18   ;;  %796 = vmatmul.mubr.msk.bf16.gmra.mxu0 %vm112_vm1, %v852_v20 }
  0x1b   :  { %239 = vperm.xlu0 %848, %v229_v19   ;;  %194 = vmatprep.mubr.bf16.mxu0 %v888_v2 }
  0x1e   :  { %308 = vperm.xlu1 %849, %v294_v21   ;;  %v206_v21 = vld [vmem:[%s1223_s1 + $0x8] sm:$0xff] }
  0x1f   :  { %303 = vperm.xlu0 %848, %v293_v22   ;;  %v205_v22 = vld [vmem:[%s1223_s1] sm:$0xff]  ;;  %s890_s1 = smov 127  }
  0x22   :  { %797 = vmatmul.mubr.msk.bf16.gmra.mxu0 %vm112_vm1, %v853_v23 }
  0x7d   :  { %v334_v28 = vpop.permute.xlu1 %333 }
  0x7e   :  { %v270_v29 = vpop.permute.xlu0 %269 }
  0x7f   :  { %v289_v30 = vmul.f32 %v270_v29, %v225_v25  ;;  %v290_v31 = vmul.f32 %v270_v29, %v226_v26  ;;  %v215_v29 = vunpack.c.l.bf16 %v206_v21 }
  0x81   :  { %v339_v35 = vpop.permute.xlu1 %338  ;;  %v353_v38 = vadd.f32 %v334_v28, %v289_v30  ;;  %v354_v39 = vadd.f32 %v334_v28, %v290_v31  ;;  %v216_v30 = vunpack.c.h.bf16 %v206_v21  ;;  %v213_v31 = vunpack.c.l.bf16 %v205_v22 }
  0x82   :  { %v275_v36 = vpop.permute.xlu0 %274 }
  0x83   :  { %v291_v40 = vmul.f32 %v275_v36, %v227_v32  ;;  %v292_v41 = vmul.f32 %v275_v36, %v228_v33  ;;  %v369_v50 = vmax.f32 %v353_v38, 0.0  ;;  %v370_v51 = vmax.f32 %v354_v39, 0.0 }
  0x84   :  { %v214_v32 = vunpack.c.h.bf16 %v205_v22 }
  0x85   :  { %v355_v44 = vadd.f32 %v339_v35, %v291_v40  ;;  %v356_v45 = vadd.f32 %v339_v35, %v292_v41  ;;  %v265_v48 = vpop.permute.xlu1 %264 }
  0x86   :  { %v260_v49 = vpop.permute.xlu0 %259  ;;  %v287_v54 = vmul.f32 %v265_v48, %v223_v42  ;;  %v288_v55 = vmul.f32 %v265_v48, %v224_v43 }
  0x87   :  { %v371_v52 = vmax.f32 %v355_v44, 0.0  ;;  %v372_v53 = vmax.f32 %v356_v45, 0.0  ;;  %v285_v58 = vmul.f32 %v260_v49, %v221_v46  ;;  %v286_v59 = vmul.f32 %v260_v49, %v222_v47 }
  0x89   :  { %v1027_v56 = vpack.c.bf16 %v371_v52, %v369_v50  ;;  %v1029_v57 = vpack.c.bf16 %v372_v53, %v370_v51  ;;  %v329_v62 = vpop.permute.xlu1 %328 }
  0x8a   :  { %v324_v63 = vpop.permute.xlu0 %323  ;;  %v351_v0 = vadd.f32 %v329_v62, %v287_v54  ;;  %v352_v1 = vadd.f32 %v329_v62, %v288_v55  ;;  %v46_v62 = vld [vmem:[%s1225_s3 + $0x10] sm:$0xff] }
  0x8b   :  { %v349_v3 = vadd.f32 %v324_v63, %v285_v58  ;;  %v350_v4 = vadd.f32 %v324_v63, %v286_v59  ;;  %403 = vrot.lane.b32.xlu1 %v1029_v57, %s889_s12  ;;  %818 = vmatprep.subr.bf16.mxu1 %v1029_v57  ;;  %v856_v59 = vld [vmem:[%s1228_s6 + $0x4] ss:$8 sps:$4 sm:$0xff]  }
  0x8c   :  { %401 = vrot.lane.b32.xlu0 %v1027_v56, %s889_s12  ;;  %v367_v9 = vmax.f32 %v351_v0, 0.0  ;;  %v368_v10 = vmax.f32 %v352_v1, 0.0  ;;  %650 = vmatprep.subr.bf16.mxu0 %v1029_v57  ;;  %v49_v63 = vld [vmem:[%s1225_s3 + $0x28] sm:$0xff]  ;;  %v48_v0 = vld [vmem:[%s1225_s3 + $0x20] sm:$0xff]  ;;  %v51_v1 = vld [vmem:[%s1225_s3 + $0x38] sm:$0xff] }
  0x8d   :  { %v365_v11 = vmax.f32 %v349_v3, 0.0  ;;  %v366_v12 = vmax.f32 %v350_v4, 0.0  ;;  %830 = vmatpush1.bf16.msra.mxu1 %v1027_v56  ;;  %651 = vmatpush1.bf16.msra.mxu0 %v1027_v56  ;;  %v255_v13 = vpop.permute.xlu1 %254  ;;  %v50_v3 = vld [vmem:[%s1225_s3 + $0x30] sm:$0xff]  ;;  %v554_v4 = vld [vmem:[%s1229_s7 + $0x8] sm:$0xff] }
  0x8e   :  { %v250_v14 = vpop.permute.xlu0 %249  ;;  %v283_v17 = vmul.f32 %v255_v13, %v219_v5  ;;  %v284_v18 = vmul.f32 %v255_v13, %v220_v6  ;;  %814 = vmatprep.mubr.msk.bf16.mxu0 %vm637_vm2, %v856_v59  ;;  %v553_v5 = vld [vmem:[%s1229_s7] sm:$0xff]  ;;  %v556_v6 = vld [vmem:[%s1229_s7 + $0x18] sm:$0xff] }
  0x8f   :  { %v1045_v15 = vpack.c.bf16 %v367_v9, %v365_v11  ;;  %v1047_v16 = vpack.c.bf16 %v368_v10, %v366_v12  ;;  %v281_v19 = vmul.f32 %v250_v14, %v217_v7  ;;  %v282_v20 = vmul.f32 %v250_v14, %v218_v8  ;;  %v555_v7 = vld [vmem:[%s1229_s7 + $0x10] sm:$0xff]  ;;  %v558_v8 = vld [vmem:[%s1229_s7 + $0x28] sm:$0xff]  ;;  %v557_v9 = vld [vmem:[%s1229_s7 + $0x20] sm:$0xff] }
  0x90   :  { %v560_v10 = vld [vmem:[%s1229_s7 + $0x38] sm:$0xff]  ;;  %v559_v11 = vld [vmem:[%s1229_s7 + $0x30] sm:$0xff]  ;;  %v466_v12 = vlaneseq }
  0x91   :  { %399 = vrot.lane.b32.xlu1 %v1047_v16, %s889_s12  ;;  %819 = vmatprep.subr.bf16.mxu1 %v1047_v16  ;;  %v319_v23 = vpop.permute.xlu1 %318 }
  0x92   :  { %397 = vrot.lane.b32.xlu0 %v1045_v15, %s889_s12  ;;  %652 = vmatprep.subr.bf16.mxu0 %v1047_v16  ;;  %v314_v24 = vpop.permute.xlu0 %313  ;;  %v347_v25 = vadd.f32 %v319_v23, %v283_v17  ;;  %v348_v26 = vadd.f32 %v319_v23, %v284_v18  ;;  %v467_v13 = vand.u32 127, %v466_v12 }
  0x93   :  { %831 = vmatpush1.bf16.msra.mxu1 %v1045_v15  ;;  %v345_v27 = vadd.f32 %v314_v24, %v281_v19  ;;  %v346_v28 = vadd.f32 %v314_v24, %v282_v20  ;;  %653 = vmatpush1.bf16.msra.mxu0 %v1045_v15 }
  0x94   :  { %v363_v33 = vmax.f32 %v347_v25, 0.0  ;;  %v364_v34 = vmax.f32 %v348_v26, 0.0  ;;  %v468_v14 = vadd.s32 128, %v467_v13  ;;  %vm493_vm3 = vcmp.ne.s32.totalorder %v467_v13, 0 }
  0x95   :  { %v361_v35 = vmax.f32 %v345_v27, 0.0  ;;  %v362_v36 = vmax.f32 %v346_v28, 0.0  ;;  %v245_v37 = vpop.permute.xlu1 %244  ;;  %vm519_vm9 = vcmp.ne.s32.totalorder %v467_v13, 127 }
  0x96   :  { %v240_v38 = vpop.permute.xlu0 %239  ;;  %v279_v41 = vmul.f32 %v245_v37, %v215_v29  ;;  %v280_v42 = vmul.f32 %v245_v37, %v216_v30 }
  0x97   :  { %v375_v39 = vpack.c.bf16 %v363_v33, %v361_v35  ;;  %v376_v40 = vpack.c.bf16 %v364_v34, %v362_v36  ;;  %v277_v43 = vmul.f32 %v240_v38, %v213_v31  ;;  %v278_v44 = vmul.f32 %v240_v38, %v214_v32 }
  0x99   :  { %395 = vrot.lane.b32.xlu1 %v376_v40, %s889_s12  ;;  %820 = vmatprep.subr.bf16.mxu1 %v376_v40  ;;  %v309_v45 = vpop.permute.xlu1 %308 }
  0x9a   :  { %393 = vrot.lane.b32.xlu0 %v375_v39, %s889_s12  ;;  %654 = vmatprep.subr.bf16.mxu0 %v376_v40  ;;  %v304_v46 = vpop.permute.xlu0 %303  ;;  %v343_v47 = vadd.f32 %v309_v45, %v279_v41  ;;  %v344_v48 = vadd.f32 %v309_v45, %v280_v42 }
  0x9b   :  { %832 = vmatpush1.bf16.msra.mxu1 %v375_v39  ;;  %v341_v49 = vadd.f32 %v304_v46, %v277_v43  ;;  %v342_v50 = vadd.f32 %v304_v46, %v278_v44  ;;  %655 = vmatpush1.bf16.msra.mxu0 %v375_v39 }
  0x9c   :  { %v359_v51 = vmax.f32 %v343_v47, 0.0  ;;  %v360_v52 = vmax.f32 %v344_v48, 0.0 }
  0x9d   :  { %v357_v53 = vmax.f32 %v341_v49, 0.0  ;;  %v358_v54 = vmax.f32 %v342_v50, 0.0 }
  0x9f   :  { %v373_v55 = vpack.c.bf16 %v359_v51, %v357_v53  ;;  %v374_v58 = vpack.c.bf16 %v360_v52, %v358_v54 }
  0xa1   :  { %391 = vrot.lane.b32.xlu1 %v374_v58, %s889_s12  ;;  %821 = vmatprep.subr.bf16.mxu1 %v374_v58 }
  0xa2   :  { %389 = vrot.lane.b32.xlu0 %v373_v55, %s889_s12  ;;  %656 = vmatprep.subr.bf16.mxu0 %v374_v58 }
  0xa3   :  { %657 = vmatpush1.bf16.msra.mxu0 %v373_v55  ;;  %833 = vmatpush1.bf16.msra.mxu1 %v373_v55 }
  0xa5   :  { %442 = vrot.lane.b32.xlu1 %v1029_v57, %s890_s1  ;;  %v44_v57 = vld [vmem:[%s1225_s3] sm:$0xff] }
  0xa6   :  { %440 = vrot.lane.b32.xlu0 %v1027_v56, %s890_s1  ;;  %v45_v56 = vld [vmem:[%s1225_s3 + $0x8] sm:$0xff] }
  0xa9   :  { %438 = vrot.lane.b32.xlu1 %v1047_v16, %s890_s1  ;;  %v502_v16 = vshrl.u32 %v466_v12, 7 }
  0xaa   :  { %436 = vrot.lane.b32.xlu0 %v1045_v15, %s890_s1  ;;  %v480_v15 = vand.u32 127, %v468_v14 }
  0xab   :  { %v503_v17 = vsub.s32 0, %v502_v16  ;;  %v507_v18 = vsub.s32 4, %v502_v16 }
  0xac   :  { %vm494_vm4 = vcmp.ne.s32.totalorder %v480_v15, 0  ;;  %vm520_vm10 = vcmp.ne.s32.totalorder %v480_v15, 127 }
  0xad   :  { %434 = vrot.lane.b32.xlu1 %v376_v40, %s890_s1  ;;  %vm499_vm5 = vmpackc.low %vm494_vm4, %vm493_vm3 }
  0xae   :  { %432 = vrot.lane.b32.xlu0 %v375_v39, %s890_s1  ;;  %v500_v19 = vsel %vm499_vm5, 65537, %v888_v2  ;;  %vm525_vm11 = vmpackc.low %vm520_vm10, %vm519_vm9 }
  0xaf   :  { %v504_v20 = vrot.slane %v500_v19, %v503_v17  ;;  %v508_v21 = vrot.slane %v500_v19, %v507_v18  ;;  %v526_v37 = vsel %vm525_vm11, 65537, %v888_v2 }
  0xb0   :  { %v534_v38 = vrot.slane %v526_v37, %v507_v18  ;;  %v530_v40 = vrot.slane %v526_v37, %v503_v17 }
  0xb1   :  { %430 = vrot.lane.b32.xlu1 %v374_v58, %s890_s1  ;;  %vm509_vm7 = vcmp.ne.s16.totalorder %v504_v20, 0  ;;  %vm510_vm8 = vcmp.ne.s16.totalorder %v508_v21, 0 }
  0xb2   :  { %428 = vrot.lane.b32.xlu0 %v373_v55, %s890_s1  ;;  %vm536_vm13 = vcmp.ne.s16.totalorder %v534_v38, 0  ;;  %vm535_vm14 = vcmp.ne.s16.totalorder %v530_v40, 0 }
  0xb5   :  { %59 = vperm.xlu1 %849, %v45_v56  }
  0xb6   :  { %54 = vperm.xlu0 %848, %v44_v57  }
  0xb9   :  { %69 = vperm.xlu1 %849, %v47_v61  }
  0xba   :  { %64 = vperm.xlu0 %848, %v46_v62  }
  0xbd   :  { %79 = vperm.xlu1 %849, %v49_v63  }
  0xbe   :  { %74 = vperm.xlu0 %848, %v48_v0   ;;  %v854_v0 = vld [vmem:[%s1228_s6] ss:$8 sps:$4 sm:$0xff]  }
  0xc1   :  { %89 = vperm.xlu1 %849, %v51_v1   ;;  %v857_v1 = vld [vmem:[%s1228_s6 + $0x10] ss:$8 sps:$4 sm:$0xff]  }
  0xc2   :  { %84 = vperm.xlu0 %848, %v50_v3   ;;  %v860_v3 = vld [vmem:[%s1228_s6 + $0x24] ss:$8 sps:$4 sm:$0xff]  }
  0xc5   :  { %568 = vperm.xlu1 %849, %v554_v4   ;;  %v862_v4 = vld [vmem:[%s1228_s6 + $0x20] ss:$8 sps:$4 sm:$0xff]  }
  0xc6   :  { %563 = vperm.xlu0 %848, %v553_v5   ;;  %v863_v5 = vld [vmem:[%s1228_s6 + $0x34] ss:$8 sps:$4 sm:$0xff]  }
  0xc9   :  { %578 = vperm.xlu1 %849, %v556_v6   ;;  %v865_v6 = vld [vmem:[%s1228_s6 + $0x30] ss:$8 sps:$4 sm:$0xff]   ;;  %s891_s6 = smov [#allocation2]  }
  0xca   :  { %573 = vperm.xlu0 %848, %v555_v7   ;;  %v166_v7 = vpop.f32.mrf.mxu0  ;;  %s777_s10 = sshll.u32 %s891_s6, 4  ;;  %s778_s10 = int_to_ptr.vmem [resolvable:$true] %s777_s10 }
  0xcb   :  { %s866_s11 = scalar_lea.vmem %s778_s10, 2048  ;;  %p871_p1 = scmp.lt.s32.totalorder %s778_s10, %s778_s10 }
  0xcc   :  { %p867_p0 = scmp.ne.s32.totalorder %s778_s10, %s866_s11  ;;  %p872_p2 = scmp.lt.s32.totalorder %s866_s11, %s866_s11 }
  0xcd   :  { %588 = vperm.xlu1 %849, %v558_v8   ;;  %v168_v8 = vpop.f32.mrf.mxu0 }
  0xce   :  { %583 = vperm.xlu0 %848, %v557_v9   ;;  %p873_p3 = por %p872_p2, %p871_p1 }
  0xcf   :  { %v170_v9 = vpop.f32.mrf.mxu0 }
  0xd0   :  { %p874_p4 = pnand %p873_p3, %p867_p0 }
  0xd1   :  { %598 = vperm.xlu1 %849, %v560_v10   ;;  %v172_v10 = vpop.f32.mrf.mxu0 }
  0xd2   :  { %593 = vperm.xlu0 %848, %v559_v11  }
  0xd3   :  { %v176_v11 = vpop.f32.mrf.mxu0 }
  0xd5   :  { %v178_v12 = vpop.f32.mrf.mxu0 }
  0xd7   :  { %v180_v13 = vpop.f32.mrf.mxu0 }
  0xd9   :  { %v182_v14 = vpop.f32.mrf.mxu0 }
  0xdb   :  { %v186_v16 = vpop.f32.mrf.mxu0 }
  0xdd   :  { %v188_v17 = vpop.f32.mrf.mxu0 }
  0xdf   :  { %v1189_v20 = vpop.f32.mrf.mxu0 }
  0xfd   :  { %v404_v22 = vpop.permute.xlu1 %403 }
  0xfe   :  { %v402_v23 = vpop.permute.xlu0 %401 }
  0xff   :  { %v409_v24 = vsel %vm405_vm6, %v402_v23, %v404_v22  ;;  %v426_v25 = vsel %vm405_vm6, 0, %v402_v23  ;;  %v1191_v23 = vpop.f32.mrf.mxu0 }
 0x100   :  { %v517_v26 = vsel %vm509_vm7, %v426_v25, 0  ;;  %806 = vmatprep.subr.msk.bf16.mxu0 %vm510_vm8, %v409_v24  ;;  %822 = vmatprep.subr.msk.bf16.mxu1 %vm510_vm8, %v409_v24 }
 0x101   :  { %659 = vmatpush1.bf16.msra.mxu0 %v517_v26  ;;  %834 = vmatpush1.bf16.msra.mxu1 %v517_v26  ;;  %v1193_v24 = vpop.f32.mrf.mxu0 }
 0x103   :  { %v400_v27 = vpop.permute.xlu1 %399 }
 0x104   :  { %v398_v28 = vpop.permute.xlu0 %397 }
 0x105   :  { %v408_v29 = vsel %vm405_vm6, %v398_v28, %v400_v27  ;;  %v423_v30 = vsel %vm405_vm6, 0, %v398_v28  ;;  %v1199_v27 = vpop.f32.mrf.mxu0 }
 0x106   :  { %v515_v31 = vsel %vm509_vm7, %v423_v30, 0  ;;  %807 = vmatprep.subr.msk.bf16.mxu0 %vm510_vm8, %v408_v29  ;;  %823 = vmatprep.subr.msk.bf16.mxu1 %vm510_vm8, %v408_v29 }
 0x107   :  { %661 = vmatpush1.bf16.msra.mxu0 %v515_v31  ;;  %835 = vmatpush1.bf16.msra.mxu1 %v515_v31  ;;  %v1203_v30 = vpop.f32.mrf.mxu0 }
 0x109   :  { %v1205_v31 = vpop.f32.mrf.mxu0 }
 0x10b   :  { %v396_v32 = vpop.permute.xlu1 %395 }
 0x10c   :  { %v394_v33 = vpop.permute.xlu0 %393 }
 0x10d   :  { %v407_v34 = vsel %vm405_vm6, %v394_v33, %v396_v32  ;;  %v420_v35 = vsel %vm405_vm6, 0, %v394_v33 }
 0x10e   :  { %v513_v36 = vsel %vm509_vm7, %v420_v35, 0  ;;  %808 = vmatprep.subr.msk.bf16.mxu0 %vm510_vm8, %v407_v34  ;;  %824 = vmatprep.subr.msk.bf16.mxu1 %vm510_vm8, %v407_v34 }
 0x10f   :  { %663 = vmatpush1.bf16.msra.mxu0 %v513_v36  ;;  %836 = vmatpush1.bf16.msra.mxu1 %v513_v36 }
 0x113   :  { %v392_v39 = vpop.permute.xlu1 %391 }
 0x114   :  { %v390_v41 = vpop.permute.xlu0 %389 }
 0x115   :  { %v406_v42 = vsel %vm405_vm6, %v390_v41, %v392_v39  ;;  %v417_v43 = vsel %vm405_vm6, 0, %v390_v41 }
 0x116   :  { %v511_v44 = vsel %vm509_vm7, %v417_v43, 0  ;;  %809 = vmatprep.subr.msk.bf16.mxu0 %vm510_vm8, %v406_v42  ;;  %825 = vmatprep.subr.msk.bf16.mxu1 %vm510_vm8, %v406_v42 }
 0x117   :  { %665 = vmatpush1.bf16.msra.mxu0 %v511_v44  ;;  %837 = vmatpush1.bf16.msra.mxu1 %v511_v44  ;;  %v443_v45 = vpop.permute.xlu1 %442 }
 0x118   :  { %v464_v2 = vsel %vm444_vm12, %v443_v45, 0  ;;  %v441_v46 = vpop.permute.xlu0 %440 }
 0x119   :  { %v448_v47 = vsel %vm444_vm12, %v441_v46, %v443_v45  ;;  %810 = vmatprep.subr.msk.bf16.mxu0 %vm536_vm13, %v464_v2  ;;  %826 = vmatprep.subr.msk.bf16.mxu1 %vm536_vm13, %v464_v2 }
 0x11a   :  { %v543_v48 = vsel %vm535_vm14, %v448_v47, 0 }
 0x11b   :  { %675 = vmatpush2.bf16.msra.mxu0 %v543_v48  ;;  %838 = vmatpush2.bf16.msra.mxu1 %v543_v48  ;;  %v439_v49 = vpop.permute.xlu1 %438 }
 0x11c   :  { %v461_v50 = vsel %vm444_vm12, %v439_v49, 0  ;;  %v437_v51 = vpop.permute.xlu0 %436 }
 0x11d   :  { %v447_v52 = vsel %vm444_vm12, %v437_v51, %v439_v49  ;;  %811 = vmatprep.subr.msk.bf16.mxu0 %vm536_vm13, %v461_v50  ;;  %827 = vmatprep.subr.msk.bf16.mxu1 %vm536_vm13, %v461_v50 }
 0x11e   :  { %v541_v53 = vsel %vm535_vm14, %v447_v52, 0 }
 0x11f   :  { %677 = vmatpush2.bf16.msra.mxu0 %v541_v53  ;;  %839 = vmatpush2.bf16.msra.mxu1 %v541_v53  ;;  %v435_v54 = vpop.permute.xlu1 %434 }
 0x120   :  { %v458_v55 = vsel %vm444_vm12, %v435_v54, 0  ;;  %v433_v58 = vpop.permute.xlu0 %432 }
 0x121   :  { %v446_v59 = vsel %vm444_vm12, %v433_v58, %v435_v54  ;;  %812 = vmatprep.subr.msk.bf16.mxu0 %vm536_vm13, %v458_v55  ;;  %828 = vmatprep.subr.msk.bf16.mxu1 %vm536_vm13, %v458_v55 }
 0x122   :  { %v539_v60 = vsel %vm535_vm14, %v446_v59, 0 }
 0x123   :  { %679 = vmatpush2.bf16.msra.mxu0 %v539_v60  ;;  %840 = vmatpush2.bf16.msra.mxu1 %v539_v60  ;;  %v431_v56 = vpop.permute.xlu1 %430 }
 0x124   :  { %v455_v57 = vsel %vm444_vm12, %v431_v56, 0  ;;  %v429_v61 = vpop.permute.xlu0 %428 }
 0x125   :  { %v445_v62 = vsel %vm444_vm12, %v429_v61, %v431_v56  ;;  %813 = vmatprep.subr.msk.bf16.mxu0 %vm536_vm13, %v455_v57  ;;  %829 = vmatprep.subr.msk.bf16.mxu1 %vm536_vm13, %v455_v57 }
 0x126   :  { %v537_v63 = vsel %vm535_vm14, %v445_v62, 0 }
 0x127   :  { %681 = vmatpush2.bf16.msra.mxu0 %v537_v63  ;;  %841 = vmatpush2.bf16.msra.mxu1 %v537_v63 }
 0x12a   :  { %683 = vmatmul.mubr.bf16.vlgmr.msra.gmra.mxu0 %v854_v0  ;;  %693 = vmatmul.mubr.bf16.vlgmr.msra.gmra.mxu1 %v857_v1 }
 0x12b   :  { %816 = vmatprep.mubr.msk.bf16.mxu1 %vm637_vm2, %v860_v3 }
 0x130   :  { %v60_v18 = vpop.permute.xlu1 %59 }
 0x131   :  { %v55_v15 = vpop.permute.xlu0 %54  ;;  %v171_v47 = vadd.f32 %v170_v9, %v60_v18  ;;  %v173_v48 = vadd.f32 %v172_v10, %v60_v18 }
 0x132   :  { %703 = vmatmul.mubr.bf16.gmra.mxu1 %v862_v4  ;;  %v167_v36 = vadd.f32 %v166_v7, %v55_v15  ;;  %v169_v40 = vadd.f32 %v168_v8, %v55_v15 }
 0x133   :  { %817 = vmatprep.mubr.msk.bf16.mxu1 %vm637_vm2, %v863_v5 }
 0x134   :  { %v70_v21 = vpop.permute.xlu1 %69 }
 0x135   :  { %v65_v19 = vpop.permute.xlu0 %64  ;;  %v181_v58 = vadd.f32 %v180_v13, %v70_v21  ;;  %v183_v59 = vadd.f32 %v182_v14, %v70_v21 }
 0x136   :  { %v177_v37 = vadd.f32 %v176_v11, %v65_v19  ;;  %v179_v41 = vadd.f32 %v178_v12, %v65_v19 }
 0x138   :  { %v1195_v25 = vpop.permute.xlu1 %79 }
 0x139   :  { %v75_v22 = vpop.permute.xlu0 %74 }
 0x13a   :  { %713 = vmatmul.mubr.bf16.gmra.mxu1 %v865_v6  ;;  %v187_v7 = vadd.f32 %v186_v16, %v75_v22  ;;  %v189_v11 = vadd.f32 %v188_v17, %v75_v22  ;;  %v191_v16 = vadd.f32 %v1189_v20, %v1195_v25  ;;  %v193_v22 = vadd.f32 %v1191_v23, %v1195_v25 }
 0x13c   :  { %v1201_v28 = vpop.permute.xlu1 %89 }
 0x13d   :  { %v1197_v26 = vpop.permute.xlu0 %84 }
 0x140   :  { %v569_v32 = vpop.permute.xlu1 %568 }
 0x141   :  { %v564_v29 = vpop.permute.xlu0 %563 }
 0x144   :  { %v579_v51 = vpop.permute.xlu1 %578 }
 0x145   :  { %v574_v33 = vpop.permute.xlu0 %573 }
 0x149   :  { %v584_v3 = vpop.permute.xlu0 %583 }
 0x1ea   :  { %v684_v34 = vpop.f32.mrf.mxu0  ;;  %v694_v35 = vpop.f32.mrf.mxu1 }
 0x1eb   :  { %v685_v38 = vadd.f32 %v684_v34, %v564_v29  ;;  %v695_v39 = vadd.f32 %v694_v35, %v574_v33 }
 0x1ec   :  { %v686_v42 = vpop.f32.mrf.mxu0  ;;  %v696_v43 = vpop.f32.mrf.mxu1 }
 0x1ed   :  { %v723_v44 = vadd.f32 %v685_v38, %v167_v36  ;;  %v727_v45 = vadd.f32 %v695_v39, %v177_v37  ;;  %v687_v2 = vadd.f32 %v686_v42, %v564_v29  ;;  %v697_v46 = vadd.f32 %v696_v43, %v574_v33  ;;  %v589_v29 = vpop.permute.xlu1 %588  ;;  %v594_v39 = vpop.permute.xlu0 %593 }
 0x1ee   :  { %v688_v49 = vpop.f32.mrf.mxu0  ;;  %v698_v50 = vpop.f32.mrf.mxu1 }
 0x1ef   :  { %v739_v52 = vmax.f32 %v723_v44, 0.0  ;;  %v743_v53 = vmax.f32 %v727_v45, 0.0  ;;  %v724_v54 = vadd.f32 %v687_v2, %v169_v40  ;;  %v728_v55 = vadd.f32 %v697_v46, %v179_v41 }
 0x1f0   :  { %v689_v60 = vadd.f32 %v688_v49, %v569_v32  ;;  %v699_v56 = vadd.f32 %v698_v50, %v579_v51  ;;  %v690_v57 = vpop.f32.mrf.mxu0  ;;  %v700_v61 = vpop.f32.mrf.mxu1  ;;  %v197_v41 = vadd.f32 %v1193_v24, %v1197_v26  ;;  %v199_v45 = vadd.f32 %v1199_v27, %v1197_v26 }
 0x1f1   :  { %755 = vst [vmem:[#allocation2] sm:$0xff] %v739_v52  ;;  %757 = vst [vmem:[#allocation2 + $0x10] sm:$0xff] %v743_v53  ;;  %v740_v62 = vmax.f32 %v724_v54, 0.0  ;;  %v744_v63 = vmax.f32 %v728_v55, 0.0  ;;  %v691_v0 = vadd.f32 %v690_v57, %v569_v32  ;;  %v701_v1 = vadd.f32 %v700_v61, %v579_v51  ;;  %v599_v46 = vpop.permute.xlu1 %598 }
 0x1f2   :  { %v725_v4 = vadd.f32 %v689_v60, %v171_v47  ;;  %v729_v5 = vadd.f32 %v699_v56, %v181_v58  ;;  %v704_v6 = vpop.f32.mrf.mxu1  ;;  %v203_v52 = vadd.f32 %v1205_v31, %v1201_v28 }
 0x1f3   :  { %764 = vst [vmem:[#allocation2 + $0x40] sm:$0xff] %v740_v62  ;;  %766 = vst [vmem:[#allocation2 + $0x50] sm:$0xff] %v744_v63  ;;  %v726_v8 = vadd.f32 %v691_v0, %v173_v48  ;;  %v730_v9 = vadd.f32 %v701_v1, %v183_v59  ;;  %v705_v10 = vadd.f32 %v704_v6, %v584_v3 }
 0x1f4   :  { %v741_v12 = vmax.f32 %v725_v4, 0.0  ;;  %v745_v13 = vmax.f32 %v729_v5, 0.0  ;;  %v706_v14 = vpop.f32.mrf.mxu1  ;;  %v201_v48 = vadd.f32 %v1203_v30, %v1201_v28 }
 0x1f5   :  { %v742_v15 = vmax.f32 %v726_v8, 0.0  ;;  %v746_v18 = vmax.f32 %v730_v9, 0.0  ;;  %v731_v19 = vadd.f32 %v705_v10, %v187_v7  ;;  %v707_v21 = vadd.f32 %v706_v14, %v584_v3 }
 0x1f6   :  { %756 = vst [vmem:[#allocation2 + $0x8] sm:$0xff] %v741_v12  ;;  %758 = vst [vmem:[#allocation2 + $0x18] sm:$0xff] %v745_v13  ;;  %v708_v32 = vpop.f32.mrf.mxu1 }
 0x1f7   :  { %765 = vst [vmem:[#allocation2 + $0x48] sm:$0xff] %v742_v15  ;;  %767 = vst [vmem:[#allocation2 + $0x58] sm:$0xff] %v746_v18  ;;  %v747_v33 = vmax.f32 %v731_v19, 0.0  ;;  %v732_v34 = vadd.f32 %v707_v21, %v189_v11  ;;  %v709_v35 = vadd.f32 %v708_v32, %v589_v29 }
 0x1f8   :  { %v710_v17 = vpop.f32.mrf.mxu1 }
 0x1f9   :  { %759 = vst [vmem:[#allocation2 + $0x20] sm:$0xff] %v747_v33  ;;  %v748_v36 = vmax.f32 %v732_v34, 0.0  ;;  %v733_v37 = vadd.f32 %v709_v35, %v191_v16  ;;  %v711_v38 = vadd.f32 %v710_v17, %v589_v29 }
 0x1fa   :  { %v714_v40 = vpop.f32.mrf.mxu1 }
 0x1fb   :  { %768 = vst [vmem:[#allocation2 + $0x60] sm:$0xff] %v748_v36  ;;  %v749_v20 = vmax.f32 %v733_v37, 0.0  ;;  %v734_v42 = vadd.f32 %v711_v38, %v193_v22  ;;  %v715_v43 = vadd.f32 %v714_v40, %v594_v39 }
 0x1fc   :  { %v716_v44 = vpop.f32.mrf.mxu1 }
 0x1fd   :  { %760 = vst [vmem:[#allocation2 + $0x28] sm:$0xff] %v749_v20  ;;  %v750_v2 = vmax.f32 %v734_v42, 0.0  ;;  %v735_v23 = vadd.f32 %v715_v43, %v197_v41  ;;  %v717_v25 = vadd.f32 %v716_v44, %v594_v39 }
 0x1fe   :  { %v718_v47 = vpop.f32.mrf.mxu1 }
 0x1ff   :  { %769 = vst [vmem:[#allocation2 + $0x68] sm:$0xff] %v750_v2  ;;  %v751_v49 = vmax.f32 %v735_v23, 0.0  ;;  %v736_v24 = vadd.f32 %v717_v25, %v199_v45  ;;  %v719_v50 = vadd.f32 %v718_v47, %v599_v46 }
 0x200   :  { %v720_v51 = vpop.f32.mrf.mxu1 }
 0x201   :  { %761 = vst [vmem:[#allocation2 + $0x30] sm:$0xff] %v751_v49  ;;  %v752_v53 = vmax.f32 %v736_v24, 0.0  ;;  %v737_v26 = vadd.f32 %v719_v50, %v201_v48  ;;  %v721_v27 = vadd.f32 %v720_v51, %v599_v46 }
 0x203   :  { %770 = vst [vmem:[#allocation2 + $0x70] sm:$0xff] %v752_v53  ;;  %v753_v54 = vmax.f32 %v737_v26, 0.0  ;;  %v738_v55 = vadd.f32 %v721_v27, %v203_v52 }
 0x205   :  { %762 = vst [vmem:[#allocation2 + $0x38] sm:$0xff] %v753_v54  ;;  %v754_v58 = vmax.f32 %v738_v55, 0.0 }
 0x207   :  { %771 = vst [vmem:[#allocation2 + $0x78] sm:$0xff] %v754_v58 }
 0x208   :  { %877 = shalt.err (!%p874_p4)
}
 0x209   :  { %s892_s12 = smov 128   ;;  %s893_s13 = smov 8  }
 0x20a   :  { %783 = dma.vmem_to_hbm [thread:$0]  %s778_s10, 2048, %s1230_s8, [#allocation3], %s892_s12, %s892_s12, %s893_s13  }
 0x20b   :  { %886 = dma.done.wait [#allocation3], 2048  }
 0x20c   :  { %887 = vsyncadd [#allocation3], 4294965248 }
 0x20d   :  { %787 = vsyncpa [#allocation3], 1 }

</bundles_post_ra>
